<compile_context>
chip_gen: v7x
topology: tpu7x:2x2x1
jax: 0.10.0
libtpu: 0.0.40
codegen_flags: <defaults>
</compile_context>

<pallas_src>
import functools

import jax
import jax.numpy as jnp
from jax import lax
from jax.experimental import pallas as pl
from jax.experimental.pallas import tpu as pltpu

EPS = 1e-5
NUM_GROUPS = 32
LANE = 128        # output channels padded to a multiple of the TPU lane width
_WPAD = 8         # sublane-aligned halo padding for the conv2 intermediate
M_TARGET = 512    # target matmul M (= images-per-step * output pixels)


def _round_up(x, m):
    return (x + m - 1) // m * m


# ----------------------------------------------------------------------------
# Fused BasicBlock kernel (one batch block per grid step)
# ----------------------------------------------------------------------------
def _make_block_kernel(NB, Ho, Wo, C1, Cp, cpg, k1, has_projection):
    P = Ho * Wo
    M = NB * P
    inv_n = 1.0 / float(P * cpg)

    def kernel(xs_ref, w1sc_ref, w2_ref, gmat_ref,
               g1_ref, b1_ref, g2_ref, b2_ref, *rest):
        if has_projection:
            gsc_ref, bsc_ref, o_ref = rest
        else:
            (o_ref,) = rest

        gmat = gmat_ref[...]            # (Cp, Cp) block-diagonal group matrix

        def group_norm(acc, g_ref, b_ref):
            # acc: (NB, P, Cp) f32 -- per-image GroupNorm, PyTorch semantics
            # (biased variance).  Padded channels form their own all-zero
            # groups and come out exactly 0 (gamma = beta = 0 there).
            s = jnp.sum(acc, axis=1)                               # (NB, Cp)
            ss = jnp.sum(acc * acc, axis=1)                        # (NB, Cp)
            g = jnp.dot(jnp.concatenate([s, ss], axis=0), gmat,
                        preferred_element_type=jnp.float32)        # (2NB, Cp)
            mean = (g[:NB] * inv_n).reshape(NB, 1, Cp)
            var = (g[NB:] * inv_n).reshape(NB, 1, Cp) - mean * mean
            inv = lax.rsqrt(jnp.maximum(var, 0.0) + EPS)
            return ((acc - mean) * inv * g_ref[...].reshape(1, 1, Cp)
                    + b_ref[...].reshape(1, 1, Cp))

        # ---- conv1 + shortcut: ONE long-K bf16 matmul (f32 MXU accumulate).
        #      Windows are sliced directly from the bf16 input (no upcast). ----
        xs = xs_ref[...]                                       # (NB,Hs,Ws,C1) bf16
        xcols1 = jnp.concatenate(
            [xs[:, dh:dh + Ho, dw:dw + Wo, :].reshape(M, C1)
             for dh in range(k1) for dw in range(k1)], axis=1)  # (M, k1*k1*C1)
        r = jnp.dot(xcols1, w1sc_ref[...],
                    preferred_element_type=jnp.float32)         # (M, 2*Cp)
        acc1 = r[:, :Cp].reshape(NB, P, Cp)
        res = r[:, Cp:].reshape(NB, P, Cp)

        # ---- GN1 + ReLU, cast to bf16 ONCE, build the zero halo in bf16 ----
        y1 = jnp.maximum(group_norm(acc1, g1_ref, b1_ref), 0.0)
        y1 = y1.astype(jnp.bfloat16).reshape(NB, Ho, Wo, Cp)
        zr = jnp.zeros((NB, 1, Wo, Cp), jnp.bfloat16)
        y1 = jnp.concatenate([zr, y1, zr], axis=1)              # (NB, Ho+2, Wo, Cp)
        zc = jnp.zeros((NB, Ho + 2, _WPAD, Cp), jnp.bfloat16)
        y1p = jnp.concatenate([zc, y1, zc], axis=2)             # (NB, Ho+2, Wo+16, Cp)

        # ---- conv2: ONE long-K matmul over the 9 shifted halo windows ----
        xcols2 = jnp.concatenate(
            [y1p[:, kh:kh + Ho, kw + _WPAD - 1:kw + _WPAD - 1 + Wo, :]
             .reshape(M, Cp)
             for kh in range(3) for kw in range(3)], axis=1)    # (M, 9*Cp)
        acc2 = jnp.dot(xcols2, w2_ref[...],
                       preferred_element_type=jnp.float32)      # (M, Cp)
        y2 = group_norm(acc2.reshape(NB, P, Cp), g2_ref, b2_ref)

        # ---- shortcut GN (projection path), residual add, final ReLU ----
        if has_projection:
            res = group_norm(res, gsc_ref, bsc_ref)
        o_ref[...] = jnp.maximum(y2 + res, 0.0).astype(o_ref.dtype)

    return kernel


# ----------------------------------------------------------------------------
# Wrapper-side layout glue (pure pad / reshape / transpose at 1x data volume)
# ----------------------------------------------------------------------------
def _space_to_depth2(xp):
    """(N, Hp, Wp, C) -> (N, ceil(Hp/2), ceil(Wp/2), 4C) with
    xs[n, i, j, (2p+q)*C + c] = xp[n, 2i+p, 2j+q, c] (zero beyond extent)."""
    N, Hp, Wp, C = xp.shape
    Hp2, Wp2 = _round_up(Hp, 2), _round_up(Wp, 2)
    xp = jnp.pad(xp, ((0, 0), (0, Hp2 - Hp), (0, Wp2 - Wp), (0, 0)))
    xs = xp.reshape(N, Hp2 // 2, 2, Wp2 // 2, 2, C).transpose(0, 1, 3, 2, 4, 5)
    return xs.reshape(N, Hp2 // 2, Wp2 // 2, 4 * C)


def _fold_weights(params, stride, in_planes, planes, C1, Cp, has_projection):
    """PyTorch-layout weights (Cout, Cin, kh, kw) -> kernel matmul operands.

    Returns (w1sc, w2) where
      w1sc: (k1*k1*C1, 2*Cp) bf16 -- conv1 taps in cols [:Cp], the 1x1 shortcut
            (or an embedded identity) in cols [Cp:], sharing one matmul.
      w2:   (9*Cp, Cp) bf16 -- conv2 taps stacked along K.
    """
    w1 = jnp.transpose(params["w1"].astype(jnp.float32), (2, 3, 1, 0))  # kh,kw,ci,co
    if stride == 1:
        k1 = 3
        taps = [jnp.zeros((C1, Cp), jnp.float32)
                .at[:in_planes, :planes].set(w1[dh, dw])
                for dh in range(3) for dw in range(3)]
        sc_tap, sc_row0 = 4, 0                     # window (1,1), full channel block
    else:
        # stride 2 -> equivalent stride-1 2x2 conv over the space-to-depth input
        k1 = 2
        taps = []
        for dh in range(2):
            for dw in range(2):
                m = jnp.zeros((C1, Cp), jnp.float32)
                for p in range(2):
                    for q in range(2):
                        kh, kw = 2 * dh + p, 2 * dw + q
                        if kh < 3 and kw < 3:
                            ph = 2 * p + q
                            m = m.at[ph * in_planes:(ph + 1) * in_planes,
                                     :planes].set(w1[kh, kw])
                taps.append(m)
        sc_tap, sc_row0 = 0, 3 * in_planes         # window (0,0), phase (1,1)
    w1_k = jnp.concatenate(taps, axis=0)           # (k1*k1*C1, Cp)

    wsc_k = jnp.zeros((k1 * k1 * C1, Cp), jnp.float32)
    r0 = sc_tap * C1 + sc_row0
    if has_projection:
        wsc = jnp.transpose(params["wsc"].astype(jnp.float32)[:, :, 0, 0], (1, 0))
        wsc_k = wsc_k.at[r0:r0 + in_planes, :planes].set(wsc)
    else:
        # identity shortcut: exact in bf16 since the input stream is bf16
        wsc_k = wsc_k.at[r0:r0 + in_planes, :in_planes].set(
            jnp.eye(in_planes, dtype=jnp.float32))
    w1sc = jnp.concatenate([w1_k, wsc_k], axis=1)  # (k1*k1*C1, 2*Cp)

    w2 = jnp.transpose(params["w2"].astype(jnp.float32), (2, 3, 1, 0))
    w2_k = jnp.concatenate(
        [jnp.zeros((Cp, Cp), jnp.float32).at[:planes, :planes].set(w2[kh, kw])
         for kh in range(3) for kw in range(3)], axis=0)        # (9*Cp, Cp)
    return w1sc.astype(jnp.bfloat16), w2_k.astype(jnp.bfloat16), k1


def _vmem_limit_bytes():
    # ~60% of physical VMEM: ~38 MiB on v7x (64 MiB/TC), ~77 MiB on v5e/v6e
    # (128 MiB).  Falls back to a 64 MiB assumption (safe on every generation).
    try:
        cap = int(pltpu.get_tpu_info().vmem_capacity_bytes)
    except Exception:
        cap = 64 * 1024 * 1024
    return int(min(cap * 0.6, 96 * 1024 * 1024))


# ----------------------------------------------------------------------------
# BasicBlock forward
# ----------------------------------------------------------------------------
def basic_block_forward(x_nchw, params, *, in_planes, planes, stride):
    assert stride in (1, 2), "ResNet BasicBlock uses stride 1 or 2"
    assert planes % NUM_GROUPS == 0, "GroupNorm(32, planes) needs planes % 32 == 0"
    cpg = planes // NUM_GROUPS

    N, Cin, H, W = x_nchw.shape
    assert Cin == in_planes
    Ho = (H - 1) // stride + 1
    Wo = (W - 1) // stride + 1
    P = Ho * Wo
    Cp = _round_up(planes, LANE)               # lane-dense output channels
    has_projection = (stride != 1) or (in_planes != planes)

    # Layout glue in plain JAX (1x data volume; no HBM im2col).
    x_nhwc = jnp.transpose(x_nchw, (0, 2, 3, 1))
    xp = jnp.pad(x_nhwc, ((0, 0), (1, 1), (1, 1), (0, 0)))
    xs = xp if stride == 1 else _space_to_depth2(xp)
    _, Hs, Ws, C1 = xs.shape
    Wsp = _round_up(Ws, 8)                     # sublane-aligned window slices
    xs = jnp.pad(xs, ((0, 0), (0, 0), (0, Wsp - Ws), (0, 0))).astype(jnp.bfloat16)

    w1sc, w2_k, k1 = _fold_weights(params, stride, in_planes, planes, C1, Cp,
                                   has_projection)
    K1 = k1 * k1 * C1

    gidx = jnp.arange(Cp, dtype=jnp.int32) // cpg
    gmat = (gidx[:, None] == gidx[None, :]).astype(jnp.float32)   # (Cp, Cp)

    def pad_vec(v):
        return jnp.zeros((1, Cp), jnp.float32).at[0, :planes].set(
            v.astype(jnp.float32))

    # Fold enough images per step that the matmul M dim hits ~M_TARGET, but keep
    # >= 2 grid steps whenever the batch allows (v7x megacore).  Odd batch sizes
    # are zero-padded instead of degrading NB.
    NB = max(1, min(N, pl.cdiv(M_TARGET, P)))
    num_blocks = pl.cdiv(N, NB)
    if num_blocks == 1 and N >= 2:
        NB = pl.cdiv(N, 2)
        num_blocks = pl.cdiv(N, NB)
    Npad = num_blocks * NB
    if Npad != N:
        xs = jnp.pad(xs, ((0, Npad - N), (0, 0), (0, 0), (0, 0)))

    inputs = [xs, w1sc, w2_k, gmat,
              pad_vec(params["g1"]), pad_vec(params["b1"]),
              pad_vec(params["g2"]), pad_vec(params["b2"])]
    vec_spec = pl.BlockSpec((1, Cp), lambda n: (0, 0))
    in_specs = [
        pl.BlockSpec((NB, Hs, Wsp, C1), lambda n: (n, 0, 0, 0)),
        pl.BlockSpec((K1, 2 * Cp), lambda n: (0, 0)),
        pl.BlockSpec((9 * Cp, Cp), lambda n: (0, 0)),
        pl.BlockSpec((Cp, Cp), lambda n: (0, 0)),
        vec_spec, vec_spec, vec_spec, vec_spec,
    ]
    if has_projection:
        inputs += [pad_vec(params["gsc"]), pad_vec(params["bsc"])]
        in_specs += [vec_spec, vec_spec]

    kernel = _make_block_kernel(NB, Ho, Wo, C1, Cp, cpg, k1, has_projection)

    out = pl.pallas_call(
        kernel,
        out_shape=jax.ShapeDtypeStruct((Npad, P, Cp), jnp.bfloat16),
        grid=(num_blocks,),
        in_specs=in_specs,
        out_specs=pl.BlockSpec((NB, P, Cp), lambda n: (n, 0, 0)),
        compiler_params=pltpu.CompilerParams(
            dimension_semantics=("parallel",),
            vmem_limit_bytes=_vmem_limit_bytes(),
        ),
    )(*inputs)

    # NOTE: a fused next-block consumer would keep the padded NHWC bf16 layout;
    # the slice / upcast / transpose below only reconstructs the PyTorch
    # module's NCHW f32 contract.
    y = out[:N, :, :planes].astype(jnp.float32).reshape(N, Ho, Wo, planes)
    return jnp.transpose(y, (0, 3, 1, 2))


# ----------------------------------------------------------------------------
# Pure-JAX reference (PyTorch semantics) for a sanity check
# ----------------------------------------------------------------------------
def _gn_ref(x, gamma, beta):
    N, H, W, C = x.shape
    g = NUM_GROUPS
    xg = x.reshape(N, H * W, g, C // g)
    mean = xg.mean(axis=(1, 3), keepdims=True)
    var = ((xg - mean) ** 2).mean(axis=(1, 3), keepdims=True)
    xn = ((xg - mean) * lax.rsqrt(var + EPS)).reshape(N, H, W, C)
    return xn * gamma.reshape(1, 1, 1, C) + beta.reshape(1, 1, 1, C)


def basic_block_ref(x_nchw, params, *, stride):
    dn = ('NHWC', 'OIHW', 'NHWC')
    x = jnp.transpose(x_nchw, (0, 2, 3, 1))
    out = lax.conv_general_dilated(x, params["w1"], (stride, stride),
                                   ((1, 1), (1, 1)), dimension_numbers=dn)
    out = jnp.maximum(_gn_ref(out, params["g1"], params["b1"]), 0.0)
    out = lax.conv_general_dilated(out, params["w2"], (1, 1),
                                   ((1, 1), (1, 1)), dimension_numbers=dn)
    out = _gn_ref(out, params["g2"], params["b2"])
    if "wsc" in params:
        sc = lax.conv_general_dilated(x, params["wsc"], (stride, stride),
                                      ((0, 0), (0, 0)), dimension_numbers=dn)
        sc = _gn_ref(sc, params["gsc"], params["bsc"])
    else:
        sc = x[:, ::stride, ::stride, :]
    return jnp.transpose(jnp.maximum(out + sc, 0.0), (0, 3, 1, 2))


# ----------------------------------------------------------------------------
# Deterministic parameter init (PyTorch weight layout) + run
# ----------------------------------------------------------------------------
def init_params(key, in_planes, planes, stride):
    ks = jax.random.split(key, 9)
    params = dict(
        w1=0.1 * jax.random.normal(ks[0], (planes, in_planes, 3, 3), jnp.float32),
        w2=0.1 * jax.random.normal(ks[1], (planes, planes, 3, 3), jnp.float32),
        g1=1.0 + 0.1 * jax.random.normal(ks[2], (planes,), jnp.float32),
        b1=0.1 * jax.random.normal(ks[3], (planes,), jnp.float32),
        g2=1.0 + 0.1 * jax.random.normal(ks[4], (planes,), jnp.float32),
        b2=0.1 * jax.random.normal(ks[5], (planes,), jnp.float32),
    )
    if stride != 1 or in_planes != planes:
        params["wsc"] = 0.1 * jax.random.normal(
            ks[6], (planes, in_planes, 1, 1), jnp.float32)
        params["gsc"] = 1.0 + 0.1 * jax.random.normal(ks[7], (planes,), jnp.float32)
        params["bsc"] = 0.1 * jax.random.normal(ks[8], (planes,), jnp.float32)
    return params


if __name__ == "__main__":
    # GroupNorm(32, planes) requires planes % 32 == 0; stride=2 with a channel
    # change exercises the projection-shortcut path.
    N, in_planes, planes, H, W, stride = 2, 32, 64, 16, 16, 2

    key = jax.random.PRNGKey(0)
    k_x, k_p = jax.random.split(key)
    x = jax.random.normal(k_x, (N, in_planes, H, W), jnp.float32)   # NCHW input
    params = init_params(k_p, in_planes, planes, stride)

    fwd = jax.jit(functools.partial(basic_block_forward,
                                    in_planes=in_planes, planes=planes,
                                    stride=stride))
    y = fwd(x, params)
    jax.block_until_ready(y)
    assert y.shape == (N, planes, H // stride, W // stride)

    # Sanity check vs. a pure-JAX f32 reference (kernel matmuls/output are
    # bf16, so use a loose tolerance; feed the reference the bf16-rounded x).
    x_bf = x.astype(jnp.bfloat16).astype(jnp.float32)
    y_ref = basic_block_ref(x_bf, params, stride=stride)
    err = float(jnp.max(jnp.abs(y - y_ref)))
    assert err < 0.2, f"kernel/reference mismatch: max abs err {err}"

    print("KERNEL_OK")
</pallas_src>

<mosaic_0001>
module attributes {stable_mosaic.version = 11 : i64} {
  func.func @kernel(%arg0: i32, %arg1: memref<1x9x16x128xbf16, #tpu.memory_space<vmem>>, %arg2: memref<512x256xbf16, #tpu.memory_space<vmem>>, %arg3: memref<1152x128xbf16, #tpu.memory_space<vmem>>, %arg4: memref<128x128xf32, #tpu.memory_space<vmem>>, %arg5: memref<1x128xf32, #tpu.memory_space<vmem>>, %arg6: memref<1x128xf32, #tpu.memory_space<vmem>>, %arg7: memref<1x128xf32, #tpu.memory_space<vmem>>, %arg8: memref<1x128xf32, #tpu.memory_space<vmem>>, %arg9: memref<1x128xf32, #tpu.memory_space<vmem>>, %arg10: memref<1x128xf32, #tpu.memory_space<vmem>>, %arg11: memref<1x64x128xbf16, #tpu.memory_space<vmem>>) attributes {dimension_semantics = [#tpu.dimension_semantics<parallel>], iteration_bounds = array<i64: 2>, scalar_prefetch = 0 : i64, scratch_operands = 0 : i64, tpu.core_type = #tpu.core_type<tc>, window_params = [{transform_indices = @transform_0, window_bounds = array<i64: 1, 9, 16, 128>}, {pipeline_mode = #tpu.pipeline_mode<synchronous>, transform_indices = @transform_1, window_bounds = array<i64: 512, 256>}, {pipeline_mode = #tpu.pipeline_mode<synchronous>, transform_indices = @transform_2, window_bounds = array<i64: 1152, 128>}, {pipeline_mode = #tpu.pipeline_mode<synchronous>, transform_indices = @transform_3, window_bounds = array<i64: 128, 128>}, {pipeline_mode = #tpu.pipeline_mode<synchronous>, transform_indices = @transform_4, window_bounds = array<i64: 1, 128>}, {pipeline_mode = #tpu.pipeline_mode<synchronous>, transform_indices = @transform_5, window_bounds = array<i64: 1, 128>}, {pipeline_mode = #tpu.pipeline_mode<synchronous>, transform_indices = @transform_6, window_bounds = array<i64: 1, 128>}, {pipeline_mode = #tpu.pipeline_mode<synchronous>, transform_indices = @transform_7, window_bounds = array<i64: 1, 128>}, {pipeline_mode = #tpu.pipeline_mode<synchronous>, transform_indices = @transform_8, window_bounds = array<i64: 1, 128>}, {pipeline_mode = #tpu.pipeline_mode<synchronous>, transform_indices = @transform_9, window_bounds = array<i64: 1, 128>}, {transform_indices = @transform_10, window_bounds = array<i64: 1, 64, 128>}]} {
    %c0 = arith.constant 0 : index
    %c0_0 = arith.constant 0 : index
    %0 = vector.load %arg4[%c0, %c0_0] : memref<128x128xf32, #tpu.memory_space<vmem>>, vector<128x128xf32>
    %c0_1 = arith.constant 0 : index
    %c0_2 = arith.constant 0 : index
    %c0_3 = arith.constant 0 : index
    %c0_4 = arith.constant 0 : index
    %1 = vector.load %arg1[%c0_1, %c0_2, %c0_3, %c0_4] : memref<1x9x16x128xbf16, #tpu.memory_space<vmem>>, vector<1x9x16x128xbf16>
    %2 = vector.extract_strided_slice %1 {offsets = [0, 0, 0, 0], sizes = [1, 8, 8, 128], strides = [1, 1, 1, 1]} : vector<1x9x16x128xbf16> to vector<1x8x8x128xbf16>
    %3 = vector.shape_cast %2 : vector<1x8x8x128xbf16> to vector<64x128xbf16>
    %4 = vector.extract_strided_slice %1 {offsets = [0, 0, 1, 0], sizes = [1, 8, 8, 128], strides = [1, 1, 1, 1]} : vector<1x9x16x128xbf16> to vector<1x8x8x128xbf16>
    %5 = vector.shape_cast %4 : vector<1x8x8x128xbf16> to vector<64x128xbf16>
    %6 = vector.extract_strided_slice %1 {offsets = [0, 1, 0, 0], sizes = [1, 8, 8, 128], strides = [1, 1, 1, 1]} : vector<1x9x16x128xbf16> to vector<1x8x8x128xbf16>
    %7 = vector.shape_cast %6 : vector<1x8x8x128xbf16> to vector<64x128xbf16>
    %8 = vector.extract_strided_slice %1 {offsets = [0, 1, 1, 0], sizes = [1, 8, 8, 128], strides = [1, 1, 1, 1]} : vector<1x9x16x128xbf16> to vector<1x8x8x128xbf16>
    %9 = vector.shape_cast %8 : vector<1x8x8x128xbf16> to vector<64x128xbf16>
    %10 = tpu.concatenate %3, %5, %7, %9 in 1 : vector<64x128xbf16>, vector<64x128xbf16>, vector<64x128xbf16>, vector<64x128xbf16> -> vector<64x512xbf16>
    %c0_5 = arith.constant 0 : index
    %c0_6 = arith.constant 0 : index
    %11 = vector.load %arg2[%c0_5, %c0_6] : memref<512x256xbf16, #tpu.memory_space<vmem>>, vector<512x256xbf16>
    %cst = arith.constant dense<0.000000e+00> : vector<64x256xf32>
    %12 = tpu.matmul %10, %11, %cst {dimension_numbers = #tpu.dot_dimension_numbers<[1], [0], [0], [1], [0, 0, 1, 1], [], []>} : vector<64x512xbf16>, vector<512x256xbf16>, vector<64x256xf32> -> vector<64x256xf32>
    %13 = vector.extract_strided_slice %12 {offsets = [0, 0], sizes = [64, 128], strides = [1, 1]} : vector<64x256xf32> to vector<64x128xf32>
    %14 = vector.shape_cast %13 : vector<64x128xf32> to vector<1x64x128xf32>
    %15 = vector.extract_strided_slice %12 {offsets = [0, 128], sizes = [64, 128], strides = [1, 1]} : vector<64x256xf32> to vector<64x128xf32>
    %16 = vector.shape_cast %15 : vector<64x128xf32> to vector<1x64x128xf32>
    %cst_7 = arith.constant dense<0.000000e+00> : vector<1x128xf32>
    %17 = vector.multi_reduction <add>, %14, %cst_7 [1] : vector<1x64x128xf32> to vector<1x128xf32>
    %18 = arith.mulf %14, %14 : vector<1x64x128xf32>
    %cst_8 = arith.constant dense<0.000000e+00> : vector<1x128xf32>
    %19 = vector.multi_reduction <add>, %18, %cst_8 [1] : vector<1x64x128xf32> to vector<1x128xf32>
    %20 = tpu.concatenate %17, %19 in 0 : vector<1x128xf32>, vector<1x128xf32> -> vector<2x128xf32>
    %cst_9 = arith.constant dense<0.000000e+00> : vector<2x128xf32>
    %21 = tpu.matmul %20, %0, %cst_9 {dimension_numbers = #tpu.dot_dimension_numbers<[1], [0], [0], [1], [0, 0, 1, 1], [], []>} : vector<2x128xf32>, vector<128x128xf32>, vector<2x128xf32> -> vector<2x128xf32>
    %22 = vector.extract_strided_slice %21 {offsets = [0, 0], sizes = [1, 128], strides = [1, 1]} : vector<2x128xf32> to vector<1x128xf32>
    %cst_10 = arith.constant 7.812500e-03 : f32
    %23 = vector.broadcast %cst_10 : f32 to vector<1x128xf32>
    %24 = arith.mulf %22, %23 : vector<1x128xf32>
    %25 = vector.shape_cast %24 : vector<1x128xf32> to vector<1x1x128xf32>
    %26 = vector.extract_strided_slice %21 {offsets = [1, 0], sizes = [1, 128], strides = [1, 1]} : vector<2x128xf32> to vector<1x128xf32>
    %cst_11 = arith.constant 7.812500e-03 : f32
    %27 = vector.broadcast %cst_11 : f32 to vector<1x128xf32>
    %28 = arith.mulf %26, %27 : vector<1x128xf32>
    %29 = vector.shape_cast %28 : vector<1x128xf32> to vector<1x1x128xf32>
    %30 = arith.mulf %25, %25 : vector<1x1x128xf32>
    %31 = arith.subf %29, %30 : vector<1x1x128xf32>
    %cst_12 = arith.constant 0.000000e+00 : f32
    %32 = vector.broadcast %cst_12 : f32 to vector<1x1x128xf32>
    %33 = arith.maximumf %31, %32 : vector<1x1x128xf32>
    %cst_13 = arith.constant 9.99999974E-6 : f32
    %34 = vector.broadcast %cst_13 : f32 to vector<1x1x128xf32>
    %35 = arith.addf %33, %34 : vector<1x1x128xf32>
    %36 = math.rsqrt %35 : vector<1x1x128xf32>
    %37 = vector.broadcast %25 : vector<1x1x128xf32> to vector<1x64x128xf32>
    %38 = arith.subf %14, %37 : vector<1x64x128xf32>
    %39 = vector.broadcast %36 : vector<1x1x128xf32> to vector<1x64x128xf32>
    %40 = arith.mulf %38, %39 : vector<1x64x128xf32>
    %c0_14 = arith.constant 0 : index
    %c0_15 = arith.constant 0 : index
    %41 = vector.load %arg5[%c0_14, %c0_15] : memref<1x128xf32, #tpu.memory_space<vmem>>, vector<1x128xf32>
    %42 = vector.shape_cast %41 : vector<1x128xf32> to vector<1x1x128xf32>
    %43 = vector.broadcast %42 : vector<1x1x128xf32> to vector<1x64x128xf32>
    %44 = arith.mulf %40, %43 : vector<1x64x128xf32>
    %c0_16 = arith.constant 0 : index
    %c0_17 = arith.constant 0 : index
    %45 = vector.load %arg6[%c0_16, %c0_17] : memref<1x128xf32, #tpu.memory_space<vmem>>, vector<1x128xf32>
    %46 = vector.shape_cast %45 : vector<1x128xf32> to vector<1x1x128xf32>
    %47 = vector.broadcast %46 : vector<1x1x128xf32> to vector<1x64x128xf32>
    %48 = arith.addf %44, %47 : vector<1x64x128xf32>
    %cst_18 = arith.constant 0.000000e+00 : f32
    %49 = vector.broadcast %cst_18 : f32 to vector<1x64x128xf32>
    %50 = arith.maximumf %48, %49 : vector<1x64x128xf32>
    %51 = arith.truncf %50 : vector<1x64x128xf32> to vector<1x64x128xbf16>
    %52 = vector.shape_cast %51 : vector<1x64x128xbf16> to vector<1x8x8x128xbf16>
    %cst_19 = arith.constant 0.000000e+00 : bf16
    %53 = vector.broadcast %cst_19 : bf16 to vector<1x1x8x128xbf16>
    %54 = tpu.concatenate %53, %52, %53 in 1 : vector<1x1x8x128xbf16>, vector<1x8x8x128xbf16>, vector<1x1x8x128xbf16> -> vector<1x10x8x128xbf16>
    %cst_20 = arith.constant 0.000000e+00 : bf16
    %55 = vector.broadcast %cst_20 : bf16 to vector<1x10x8x128xbf16>
    %56 = tpu.concatenate %55, %54, %55 in 2 : vector<1x10x8x128xbf16>, vector<1x10x8x128xbf16>, vector<1x10x8x128xbf16> -> vector<1x10x24x128xbf16>
    %57 = vector.extract_strided_slice %56 {offsets = [0, 0, 7, 0], sizes = [1, 8, 8, 128], strides = [1, 1, 1, 1]} : vector<1x10x24x128xbf16> to vector<1x8x8x128xbf16>
    %58 = vector.shape_cast %57 : vector<1x8x8x128xbf16> to vector<64x128xbf16>
    %59 = vector.extract_strided_slice %56 {offsets = [0, 0, 8, 0], sizes = [1, 8, 8, 128], strides = [1, 1, 1, 1]} : vector<1x10x24x128xbf16> to vector<1x8x8x128xbf16>
    %60 = vector.shape_cast %59 : vector<1x8x8x128xbf16> to vector<64x128xbf16>
    %61 = vector.extract_strided_slice %56 {offsets = [0, 0, 9, 0], sizes = [1, 8, 8, 128], strides = [1, 1, 1, 1]} : vector<1x10x24x128xbf16> to vector<1x8x8x128xbf16>
    %62 = vector.shape_cast %61 : vector<1x8x8x128xbf16> to vector<64x128xbf16>
    %63 = vector.extract_strided_slice %56 {offsets = [0, 1, 7, 0], sizes = [1, 8, 8, 128], strides = [1, 1, 1, 1]} : vector<1x10x24x128xbf16> to vector<1x8x8x128xbf16>
    %64 = vector.shape_cast %63 : vector<1x8x8x128xbf16> to vector<64x128xbf16>
    %65 = vector.extract_strided_slice %56 {offsets = [0, 1, 8, 0], sizes = [1, 8, 8, 128], strides = [1, 1, 1, 1]} : vector<1x10x24x128xbf16> to vector<1x8x8x128xbf16>
    %66 = vector.shape_cast %65 : vector<1x8x8x128xbf16> to vector<64x128xbf16>
    %67 = vector.extract_strided_slice %56 {offsets = [0, 1, 9, 0], sizes = [1, 8, 8, 128], strides = [1, 1, 1, 1]} : vector<1x10x24x128xbf16> to vector<1x8x8x128xbf16>
    %68 = vector.shape_cast %67 : vector<1x8x8x128xbf16> to vector<64x128xbf16>
    %69 = vector.extract_strided_slice %56 {offsets = [0, 2, 7, 0], sizes = [1, 8, 8, 128], strides = [1, 1, 1, 1]} : vector<1x10x24x128xbf16> to vector<1x8x8x128xbf16>
    %70 = vector.shape_cast %69 : vector<1x8x8x128xbf16> to vector<64x128xbf16>
    %71 = vector.extract_strided_slice %56 {offsets = [0, 2, 8, 0], sizes = [1, 8, 8, 128], strides = [1, 1, 1, 1]} : vector<1x10x24x128xbf16> to vector<1x8x8x128xbf16>
    %72 = vector.shape_cast %71 : vector<1x8x8x128xbf16> to vector<64x128xbf16>
    %73 = vector.extract_strided_slice %56 {offsets = [0, 2, 9, 0], sizes = [1, 8, 8, 128], strides = [1, 1, 1, 1]} : vector<1x10x24x128xbf16> to vector<1x8x8x128xbf16>
    %74 = vector.shape_cast %73 : vector<1x8x8x128xbf16> to vector<64x128xbf16>
    %75 = tpu.concatenate %58, %60, %62, %64, %66, %68, %70, %72, %74 in 1 : vector<64x128xbf16>, vector<64x128xbf16>, vector<64x128xbf16>, vector<64x128xbf16>, vector<64x128xbf16>, vector<64x128xbf16>, vector<64x128xbf16>, vector<64x128xbf16>, vector<64x128xbf16> -> vector<64x1152xbf16>
    %c0_21 = arith.constant 0 : index
    %c0_22 = arith.constant 0 : index
    %76 = vector.load %arg3[%c0_21, %c0_22] : memref<1152x128xbf16, #tpu.memory_space<vmem>>, vector<1152x128xbf16>
    %cst_23 = arith.constant dense<0.000000e+00> : vector<64x128xf32>
    %77 = tpu.matmul %75, %76, %cst_23 {dimension_numbers = #tpu.dot_dimension_numbers<[1], [0], [0], [1], [0, 0, 1, 1], [], []>} : vector<64x1152xbf16>, vector<1152x128xbf16>, vector<64x128xf32> -> vector<64x128xf32>
    %78 = vector.shape_cast %77 : vector<64x128xf32> to vector<1x64x128xf32>
    %cst_24 = arith.constant dense<0.000000e+00> : vector<1x128xf32>
    %79 = vector.multi_reduction <add>, %78, %cst_24 [1] : vector<1x64x128xf32> to vector<1x128xf32>
    %80 = arith.mulf %78, %78 : vector<1x64x128xf32>
    %cst_25 = arith.constant dense<0.000000e+00> : vector<1x128xf32>
    %81 = vector.multi_reduction <add>, %80, %cst_25 [1] : vector<1x64x128xf32> to vector<1x128xf32>
    %82 = tpu.concatenate %79, %81 in 0 : vector<1x128xf32>, vector<1x128xf32> -> vector<2x128xf32>
    %cst_26 = arith.constant dense<0.000000e+00> : vector<2x128xf32>
    %83 = tpu.matmul %82, %0, %cst_26 {dimension_numbers = #tpu.dot_dimension_numbers<[1], [0], [0], [1], [0, 0, 1, 1], [], []>} : vector<2x128xf32>, vector<128x128xf32>, vector<2x128xf32> -> vector<2x128xf32>
    %84 = vector.extract_strided_slice %83 {offsets = [0, 0], sizes = [1, 128], strides = [1, 1]} : vector<2x128xf32> to vector<1x128xf32>
    %cst_27 = arith.constant 7.812500e-03 : f32
    %85 = vector.broadcast %cst_27 : f32 to vector<1x128xf32>
    %86 = arith.mulf %84, %85 : vector<1x128xf32>
    %87 = vector.shape_cast %86 : vector<1x128xf32> to vector<1x1x128xf32>
    %88 = vector.extract_strided_slice %83 {offsets = [1, 0], sizes = [1, 128], strides = [1, 1]} : vector<2x128xf32> to vector<1x128xf32>
    %cst_28 = arith.constant 7.812500e-03 : f32
    %89 = vector.broadcast %cst_28 : f32 to vector<1x128xf32>
    %90 = arith.mulf %88, %89 : vector<1x128xf32>
    %91 = vector.shape_cast %90 : vector<1x128xf32> to vector<1x1x128xf32>
    %92 = arith.mulf %87, %87 : vector<1x1x128xf32>
    %93 = arith.subf %91, %92 : vector<1x1x128xf32>
    %cst_29 = arith.constant 0.000000e+00 : f32
    %94 = vector.broadcast %cst_29 : f32 to vector<1x1x128xf32>
    %95 = arith.maximumf %93, %94 : vector<1x1x128xf32>
    %cst_30 = arith.constant 9.99999974E-6 : f32
    %96 = vector.broadcast %cst_30 : f32 to vector<1x1x128xf32>
    %97 = arith.addf %95, %96 : vector<1x1x128xf32>
    %98 = math.rsqrt %97 : vector<1x1x128xf32>
    %99 = vector.broadcast %87 : vector<1x1x128xf32> to vector<1x64x128xf32>
    %100 = arith.subf %78, %99 : vector<1x64x128xf32>
    %101 = vector.broadcast %98 : vector<1x1x128xf32> to vector<1x64x128xf32>
    %102 = arith.mulf %100, %101 : vector<1x64x128xf32>
    %c0_31 = arith.constant 0 : index
    %c0_32 = arith.constant 0 : index
    %103 = vector.load %arg7[%c0_31, %c0_32] : memref<1x128xf32, #tpu.memory_space<vmem>>, vector<1x128xf32>
    %104 = vector.shape_cast %103 : vector<1x128xf32> to vector<1x1x128xf32>
    %105 = vector.broadcast %104 : vector<1x1x128xf32> to vector<1x64x128xf32>
    %106 = arith.mulf %102, %105 : vector<1x64x128xf32>
    %c0_33 = arith.constant 0 : index
    %c0_34 = arith.constant 0 : index
    %107 = vector.load %arg8[%c0_33, %c0_34] : memref<1x128xf32, #tpu.memory_space<vmem>>, vector<1x128xf32>
    %108 = vector.shape_cast %107 : vector<1x128xf32> to vector<1x1x128xf32>
    %109 = vector.broadcast %108 : vector<1x1x128xf32> to vector<1x64x128xf32>
    %110 = arith.addf %106, %109 : vector<1x64x128xf32>
    %cst_35 = arith.constant dense<0.000000e+00> : vector<1x128xf32>
    %111 = vector.multi_reduction <add>, %16, %cst_35 [1] : vector<1x64x128xf32> to vector<1x128xf32>
    %112 = arith.mulf %16, %16 : vector<1x64x128xf32>
    %cst_36 = arith.constant dense<0.000000e+00> : vector<1x128xf32>
    %113 = vector.multi_reduction <add>, %112, %cst_36 [1] : vector<1x64x128xf32> to vector<1x128xf32>
    %114 = tpu.concatenate %111, %113 in 0 : vector<1x128xf32>, vector<1x128xf32> -> vector<2x128xf32>
    %cst_37 = arith.constant dense<0.000000e+00> : vector<2x128xf32>
    %115 = tpu.matmul %114, %0, %cst_37 {dimension_numbers = #tpu.dot_dimension_numbers<[1], [0], [0], [1], [0, 0, 1, 1], [], []>} : vector<2x128xf32>, vector<128x128xf32>, vector<2x128xf32> -> vector<2x128xf32>
    %116 = vector.extract_strided_slice %115 {offsets = [0, 0], sizes = [1, 128], strides = [1, 1]} : vector<2x128xf32> to vector<1x128xf32>
    %cst_38 = arith.constant 7.812500e-03 : f32
    %117 = vector.broadcast %cst_38 : f32 to vector<1x128xf32>
    %118 = arith.mulf %116, %117 : vector<1x128xf32>
    %119 = vector.shape_cast %118 : vector<1x128xf32> to vector<1x1x128xf32>
    %120 = vector.extract_strided_slice %115 {offsets = [1, 0], sizes = [1, 128], strides = [1, 1]} : vector<2x128xf32> to vector<1x128xf32>
    %cst_39 = arith.constant 7.812500e-03 : f32
    %121 = vector.broadcast %cst_39 : f32 to vector<1x128xf32>
    %122 = arith.mulf %120, %121 : vector<1x128xf32>
    %123 = vector.shape_cast %122 : vector<1x128xf32> to vector<1x1x128xf32>
    %124 = arith.mulf %119, %119 : vector<1x1x128xf32>
    %125 = arith.subf %123, %124 : vector<1x1x128xf32>
    %cst_40 = arith.constant 0.000000e+00 : f32
    %126 = vector.broadcast %cst_40 : f32 to vector<1x1x128xf32>
    %127 = arith.maximumf %125, %126 : vector<1x1x128xf32>
    %cst_41 = arith.constant 9.99999974E-6 : f32
    %128 = vector.broadcast %cst_41 : f32 to vector<1x1x128xf32>
    %129 = arith.addf %127, %128 : vector<1x1x128xf32>
    %130 = math.rsqrt %129 : vector<1x1x128xf32>
    %131 = vector.broadcast %119 : vector<1x1x128xf32> to vector<1x64x128xf32>
    %132 = arith.subf %16, %131 : vector<1x64x128xf32>
    %133 = vector.broadcast %130 : vector<1x1x128xf32> to vector<1x64x128xf32>
    %134 = arith.mulf %132, %133 : vector<1x64x128xf32>
    %c0_42 = arith.constant 0 : index
    %c0_43 = arith.constant 0 : index
    %135 = vector.load %arg9[%c0_42, %c0_43] : memref<1x128xf32, #tpu.memory_space<vmem>>, vector<1x128xf32>
    %136 = vector.shape_cast %135 : vector<1x128xf32> to vector<1x1x128xf32>
    %137 = vector.broadcast %136 : vector<1x1x128xf32> to vector<1x64x128xf32>
    %138 = arith.mulf %134, %137 : vector<1x64x128xf32>
    %c0_44 = arith.constant 0 : index
    %c0_45 = arith.constant 0 : index
    %139 = vector.load %arg10[%c0_44, %c0_45] : memref<1x128xf32, #tpu.memory_space<vmem>>, vector<1x128xf32>
    %140 = vector.shape_cast %139 : vector<1x128xf32> to vector<1x1x128xf32>
    %141 = vector.broadcast %140 : vector<1x1x128xf32> to vector<1x64x128xf32>
    %142 = arith.addf %138, %141 : vector<1x64x128xf32>
    %143 = arith.addf %110, %142 : vector<1x64x128xf32>
    %cst_46 = arith.constant 0.000000e+00 : f32
    %144 = vector.broadcast %cst_46 : f32 to vector<1x64x128xf32>
    %145 = arith.maximumf %143, %144 : vector<1x64x128xf32>
    %146 = arith.truncf %145 : vector<1x64x128xf32> to vector<1x64x128xbf16>
    %c0_47 = arith.constant 0 : index
    %c0_48 = arith.constant 0 : index
    %c0_49 = arith.constant 0 : index
    %147 = vector.load %arg11[%c0_47, %c0_48, %c0_49] : memref<1x64x128xbf16, #tpu.memory_space<vmem>>, vector<1x64x128xbf16>
    tpu.vector_store %arg11[%c0_47, %c0_48, %c0_49], %146 {strides = array<i32>} : memref<1x64x128xbf16, #tpu.memory_space<vmem>>, vector<1x64x128xbf16>,
    return
  }
  func.func @transform_0(%arg0: i32) -> (i32, i32, i32, i32) {
    %c0_i32 = arith.constant 0 : i32
    %c0_i32_0 = arith.constant 0 : i32
    %c0_i32_1 = arith.constant 0 : i32
    %c0_i32_2 = arith.constant 0 : i32
    return %arg0, %c0_i32, %c0_i32_0, %c0_i32_1 : i32, i32, i32, i32
  }
  func.func @transform_1(%arg0: i32) -> (i32, i32) {
    %c0_i32 = arith.constant 0 : i32
    %c0_i32_0 = arith.constant 0 : i32
    %c0_i32_1 = arith.constant 0 : i32
    return %c0_i32, %c0_i32_0 : i32, i32
  }
  func.func @transform_2(%arg0: i32) -> (i32, i32) {
    %c0_i32 = arith.constant 0 : i32
    %c0_i32_0 = arith.constant 0 : i32
    %c0_i32_1 = arith.constant 0 : i32
    return %c0_i32, %c0_i32_0 : i32, i32
  }
  func.func @transform_3(%arg0: i32) -> (i32, i32) {
    %c0_i32 = arith.constant 0 : i32
    %c0_i32_0 = arith.constant 0 : i32
    %c0_i32_1 = arith.constant 0 : i32
    return %c0_i32, %c0_i32_0 : i32, i32
  }
  func.func @transform_4(%arg0: i32) -> (i32, i32) {
    %c0_i32 = arith.constant 0 : i32
    %c0_i32_0 = arith.constant 0 : i32
    %c0_i32_1 = arith.constant 0 : i32
    return %c0_i32, %c0_i32_0 : i32, i32
  }
  func.func @transform_5(%arg0: i32) -> (i32, i32) {
    %c0_i32 = arith.constant 0 : i32
    %c0_i32_0 = arith.constant 0 : i32
    %c0_i32_1 = arith.constant 0 : i32
    return %c0_i32, %c0_i32_0 : i32, i32
  }
  func.func @transform_6(%arg0: i32) -> (i32, i32) {
    %c0_i32 = arith.constant 0 : i32
    %c0_i32_0 = arith.constant 0 : i32
    %c0_i32_1 = arith.constant 0 : i32
    return %c0_i32, %c0_i32_0 : i32, i32
  }
  func.func @transform_7(%arg0: i32) -> (i32, i32) {
    %c0_i32 = arith.constant 0 : i32
    %c0_i32_0 = arith.constant 0 : i32
    %c0_i32_1 = arith.constant 0 : i32
    return %c0_i32, %c0_i32_0 : i32, i32
  }
  func.func @transform_8(%arg0: i32) -> (i32, i32) {
    %c0_i32 = arith.constant 0 : i32
    %c0_i32_0 = arith.constant 0 : i32
    %c0_i32_1 = arith.constant 0 : i32
    return %c0_i32, %c0_i32_0 : i32, i32
  }
  func.func @transform_9(%arg0: i32) -> (i32, i32) {
    %c0_i32 = arith.constant 0 : i32
    %c0_i32_0 = arith.constant 0 : i32
    %c0_i32_1 = arith.constant 0 : i32
    return %c0_i32, %c0_i32_0 : i32, i32
  }
  func.func @transform_10(%arg0: i32) -> (i32, i32, i32) {
    %c0_i32 = arith.constant 0 : i32
    %c0_i32_0 = arith.constant 0 : i32
    %c0_i32_1 = arith.constant 0 : i32
    return %arg0, %c0_i32, %c0_i32_0 : i32, i32, i32
  }
}

</mosaic_0001>

<bundles_post_ra>
// kernel: basic_block_forward.1
= control target key start
LH: loop header
LB: loop body
LE: loop exit
PB: predicated region body
PF: predicated region fallthrough
CT: control target
= control target key end

     0   :  { %s3961_s13 = smov 0   ;;  %s5208_s0 = inlined_call_operand.vmem [shape: bf16[2,9,16,128], index: 0, kind: input, shape index: {}]   ;;  %s5209_s1 = inlined_call_operand.vmem [shape: bf16[512,256], index: 1, kind: input, shape index: {}]   ;;  %s5210_s2 = inlined_call_operand.vmem [shape: bf16[1152,128], index: 2, kind: input, shape index: {}]   ;;  %s5211_s3 = inlined_call_operand.vmem [shape: f32[128,128], index: 3, kind: input, shape index: {}]   ;;  %s5212_s4 = inlined_call_operand.vmem [shape: f32[1,128], index: 4, kind: input, shape index: {}]   ;;  %s5213_s5 = inlined_call_operand.vmem [shape: f32[1,128], index: 5, kind: input, shape index: {}]   ;;  %s5214_s6 = inlined_call_operand.vmem [shape: f32[1,128], index: 6, kind: input, shape index: {}]   ;;  %s5215_s7 = inlined_call_operand.vmem [shape: f32[1,128], index: 7, kind: input, shape index: {}]   ;;  %s5216_s8 = inlined_call_operand.vmem [shape: f32[1,128], index: 8, kind: input, shape index: {}]   ;;  %s5217_s9 = inlined_call_operand.vmem [shape: f32[1,128], index: 9, kind: input, shape index: {}]   ;;  %s5218_s10 = inlined_call_operand.vmem [shape: bf16[2,64,128], index: 10, kind: output, shape index: {}]  }
   0x1 LB: > { %s2980_s14 = sadd.s32 4294967295, %s3900_s13   ;;  %p2984_p0 = scmp.ge.s32.totalorder %s3900_s13, 1  ;;  %s3900_s13 = sphi %s3961_s13, %s20_s13  }
   0x2   : > { %p312_p1 = scmp.lt.s32.totalorder %s3900_s13, 3 }
   0x4   : > { %p313_p2 = pnand %p2984_p0, %p312_p1 }
   0x6   : > { %316 = sbr.rel (%p313_p2) target bundleno = 1251 (0x4e3), region = 60 }
   0xd   : > { %v3712_v0 = vld [vmem:[%s5209_s1 + $0x4] ss:$8 sps:$4 sm:$0xff]   ;;  %v3714_v1 = vld [vmem:[%s5209_s1] ss:$8 sps:$4 sm:$0xff]   ;;  %v3715_v2 = vld [vmem:[%s5209_s1 + $0x14] ss:$8 sps:$4 sm:$0xff]  }
   0xe   : > { %967 = vmatprep.subr.bf16.mxu0 %v3712_v0  ;;  %v3717_v3 = vld [vmem:[%s5209_s1 + $0x10] ss:$8 sps:$4 sm:$0xff]   ;;  %v3718_v4 = vld [vmem:[%s5209_s1 + $0x24] ss:$8 sps:$4 sm:$0xff]   ;;  %p350_p3 = scmp.lt.s32.totalorder %s2980_s14, 1  ;;  %vm3903_vm3 = vmmov 0  }
   0xf   : > { %968 = vmatpush1.bf16.msra.mxu0 %v3714_v1  ;;  %v3720_v5 = vld [vmem:[%s5209_s1 + $0x20] ss:$8 sps:$4 sm:$0xff]   ;;  %v3721_v6 = vld [vmem:[%s5209_s1 + $0x34] ss:$8 sps:$4 sm:$0xff]   ;;  %v3723_v7 = vld [vmem:[%s5209_s1 + $0x30] ss:$8 sps:$4 sm:$0xff]  }
  0x10   : > { %969 = vmatprep.subr.bf16.mxu0 %v3715_v2  ;;  %s5276_s14 = smov (!%p350_p3, %s2980_s14), 1  ;;  %v3724_v8 = vld [vmem:[%s5209_s1 + $0x44] ss:$8 sps:$4 sm:$0xff]   ;;  %v3726_v9 = vld [vmem:[%s5209_s1 + $0x40] ss:$8 sps:$4 sm:$0xff]   ;;  %vm1147_vm4 = vcmask 1040384  }
  0x11   : > { %s3699_s15 = smul.u32 72, %s5276_s14  ;;  %v3727_v10 = vld [vmem:[%s5209_s1 + $0x54] ss:$8 sps:$4 sm:$0xff]   ;;  %v3729_v11 = vld [vmem:[%s5209_s1 + $0x50] ss:$8 sps:$4 sm:$0xff]   ;;  %vm1324_vm5 = vcmask 1043456  }
  0x12   : > { %v3730_v12 = vld [vmem:[%s5209_s1 + $0x64] ss:$8 sps:$4 sm:$0xff]   ;;  %vm395_vm0 = vsmask.f32 3328  ;;  %v3732_v17 = vld [vmem:[%s5209_s1 + $0x60] ss:$8 sps:$4 sm:$0xff]  }
  0x13   : > { %970 = vmatpush1.bf16.msra.mxu0 %v3717_v3  ;;  %s4008_s22 = scalar_lea.vmem %s5208_s0, %s3699_s15  ;;  %v3733_v22 = vld [vmem:[%s5209_s1 + $0x74] ss:$8 sps:$4 sm:$0xff]   ;;  %vm396_vm1 = vsmask.f32 7440  ;;  %v3735_v28 = vld [vmem:[%s5209_s1 + $0x70] ss:$8 sps:$4 sm:$0xff]  }
  0x14   : > { %971 = vmatprep.subr.bf16.mxu0 %v3718_v4  ;;  %v4017_v13 = vld [vmem:[%s4008_s22] sm:$0xf]  ;;  %v378_v14 = vld [vmem:[%s4008_s22 + $0x4] sm:$0xf]  ;;  %v4021_v15 = vld [vmem:[%s4008_s22 + $0x8] sm:$0xf] }
  0x15   : > { %v380_v16 = vld [vmem:[%s4008_s22 + $0xc] sm:$0xf]  ;;  %v399_v18 = vshrl.u32 %v4017_v13, 16  ;;  %v402_v19 = vshll.u32 %v4017_v13, 16  ;;  %v408_v20 = vshll.u32 %v378_v14, 16  ;;  %v413_v21 = vshrl.u32 %v4021_v15, 16  ;;  %vm4046_vm2 = vmor %vm395_vm0, %vm396_vm1 }
  0x16   : > { %v416_v23 = vshll.u32 %v4021_v15, 16  ;;  %v422_v24 = vshll.u32 %v380_v16, 16  ;;  %v4038_v29 = vld [vmem:[%s4008_s22 + $0x10] sm:$0xf]  ;;  %v3736_v31 = vld [vmem:[%s5209_s1 + $0x84] ss:$8 sps:$4 sm:$0xff]  }
  0x17   : > { %972 = vmatpush1.bf16.msra.mxu0 %v3720_v5  ;;  %v401_v25 = vrot.slane %v399_v18, 4  ;;  %v404_v26 = vrot.slane %v402_v19, 5  ;;  %v415_v27 = vrot.slane %v413_v21, 4  ;;  %v410_v33 = vrot.slane %v408_v20, 5  ;;  %v3738_v40 = vld [vmem:[%s5209_s1 + $0x80] ss:$8 sps:$4 sm:$0xff]  }
  0x18   : > { %973 = vmatprep.subr.bf16.mxu0 %v3721_v6  ;;  %v418_v30 = vrot.slane %v416_v23, 5  ;;  %v2996_v34 = vcombine.low %v4021_v15, %v4038_v29  ;;  %v424_v37 = vrot.slane %v422_v24, 5  ;;  %v3739_v42 = vld [vmem:[%s5209_s1 + $0x94] ss:$8 sps:$4 sm:$0xff]   ;;  %v3741_v45 = vld [vmem:[%s5209_s1 + $0x90] ss:$8 sps:$4 sm:$0xff]  }
  0x19   : > { %v405_v32 = vor.u32 %v404_v26, %v401_v25  ;;  %v427_v46 = vshrl.u32 %v4038_v29, 16  ;;  %v3742_v47 = vld [vmem:[%s5209_s1 + $0xa4] ss:$8 sps:$4 sm:$0xff]   ;;  %v430_v48 = vshll.u32 %v4038_v29, 16  ;;  %v3744_v49 = vld [vmem:[%s5209_s1 + $0xa0] ss:$8 sps:$4 sm:$0xff]  }
  0x1a   : > { %v419_v36 = vor.u32 %v418_v30, %v415_v27  ;;  %v3745_v50 = vld [vmem:[%s5209_s1 + $0xb4] ss:$8 sps:$4 sm:$0xff]   ;;  %v4079_v53 = vld [vmem:[%s4008_s22 + $0x18] sm:$0xf]  ;;  %v3748_v58 = vld [vmem:[%s5209_s1 + $0xc4] ss:$8 sps:$4 sm:$0xff]  }
  0x1b   : > { %974 = vmatpush1.bf16.msra.mxu0 %v3723_v7  ;;  %v406_v38 = vrot.slane %v405_v32, 4  ;;  %v382_v51 = vld [vmem:[%s4008_s22 + $0x14] sm:$0xf]  ;;  %v429_v52 = vrot.slane %v427_v46, 4  ;;  %v432_v54 = vrot.slane %v430_v48, 5  ;;  %v441_v55 = vshrl.u32 %v4079_v53, 16 }
  0x1c   : > { %975 = vmatprep.subr.bf16.mxu0 %v3724_v8  ;;  %v420_v39 = vrot.slane %v419_v36, 4  ;;  %v444_v56 = vshll.u32 %v4079_v53, 16  ;;  %v3747_v57 = vld [vmem:[%s5209_s1 + $0xb0] ss:$8 sps:$4 sm:$0xff]   ;;  %v436_v59 = vshll.u32 %v382_v51, 16  ;;  %v3865_v35 = vld [vmem:[%s5210_s2 + $0x100] sm:$0xff]  }
  0x1d   : > { %v411_v41 = vsel %vm4046_vm2, %v406_v38, %v410_v33  ;;  %v384_v60 = vld [vmem:[%s4008_s22 + $0x1c] sm:$0xf]  ;;  %v443_v61 = vrot.slane %v441_v55, 4  ;;  %v4091_v63 = vld [vmem:[%s4008_s22 + $0x20] sm:$0xf]  ;;  %v433_v0 = vor.u32 %v432_v54, %v429_v52 }
  0x1e   : > { %v4060_v43 = vsel %vm4046_vm2, %v420_v39, %v424_v37  ;;  %v446_v62 = vrot.slane %v444_v56, 5  ;;  %v386_v1 = vld [vmem:[%s4008_s22 + $0x24] sm:$0xf]  ;;  %v4095_v2 = vld [vmem:[%s4008_s22 + $0x28] sm:$0xf]  ;;  %v455_v3 = vshrl.u32 %v4091_v63, 16  ;;  %v2997_v5 = vcombine.low %v4079_v53, %v4091_v63 }
  0x1f   : > { %976 = vmatpush1.bf16.msra.mxu0 %v3726_v9  ;;  %v2992_v44 = vcombine.low %v411_v41, %v4060_v43  ;;  %v458_v4 = vshll.u32 %v4091_v63, 16  ;;  %v388_v6 = vld [vmem:[%s4008_s22 + $0x2c] sm:$0xf]  ;;  %v469_v7 = vshrl.u32 %v4095_v2, 16  ;;  %v472_v8 = vshll.u32 %v4095_v2, 16 }
  0x20   : > { %977 = vmatprep.subr.bf16.mxu0 %v3727_v10  ;;  %v3750_v9 = vld [vmem:[%s5209_s1 + $0xc0] ss:$8 sps:$4 sm:$0xff]   ;;  %v457_v10 = vrot.slane %v455_v3, 4  ;;  %v447_v14 = vor.u32 %v446_v62, %v443_v61  ;;  %v450_v16 = vshll.u32 %v384_v60, 16  ;;  %v434_v19 = vrot.slane %v433_v0, 4 }
  0x21   : > { %999 = vmatprep.mubr.bf16.mxu0 %v2992_v44  ;;  %v474_v18 = vrot.slane %v472_v8, 5  ;;  %v438_v20 = vrot.slane %v436_v59, 5  ;;  %v464_v21 = vshll.u32 %v386_v1, 16  ;;  %v4111_v23 = vld [vmem:[%s4008_s22 + $0x30] sm:$0xf] }
  0x22   : > { %v390_v24 = vld [vmem:[%s4008_s22 + $0x34] sm:$0xf]  ;;  %v4115_v25 = vld [vmem:[%s4008_s22 + $0x38] sm:$0xf]  ;;  %v392_v26 = vld [vmem:[%s4008_s22 + $0x3c] sm:$0xf]  ;;  %v2998_v27 = vcombine.low %v4095_v2, %v4111_v23 }
  0x23   : > { %978 = vmatpush1.bf16.msra.mxu0 %v3729_v11  ;;  %v460_v11 = vrot.slane %v458_v4, 5  ;;  %v483_v32 = vshrl.u32 %v4111_v23, 16  ;;  %v486_v33 = vshll.u32 %v4111_v23, 16  ;;  %v3754_v36 = vld [vmem:[%s5209_s1 + $0xe4] ss:$8 sps:$4 sm:$0xff]   ;;  %v448_v37 = vrot.slane %v447_v14, 4 }
  0x24   : > { %979 = vmatprep.subr.bf16.mxu0 %v3730_v12  ;;  %v3751_v12 = vld [vmem:[%s5209_s1 + $0xd4] ss:$8 sps:$4 sm:$0xff]   ;;  %v452_v38 = vrot.slane %v450_v16, 5  ;;  %v497_v39 = vshrl.u32 %v4115_v25, 16  ;;  %v492_v44 = vshll.u32 %v390_v24, 16 }
  0x25   : > { %v461_v30 = vor.u32 %v460_v11, %v457_v10  ;;  %v485_v41 = vrot.slane %v483_v32, 4  ;;  %v3756_v46 = vld [vmem:[%s5209_s1 + $0xe0] ss:$8 sps:$4 sm:$0xff]   ;;  %v3757_v51 = vld [vmem:[%s5209_s1 + $0xf4] ss:$8 sps:$4 sm:$0xff]   ;;  %v439_v11 = vsel %vm4046_vm2, %v434_v19, %v438_v20 }
  0x26   : > { %v4137_v55 = vld [vmem:[%s4008_s22 + $0x40] sm:$0xf]  ;;  %v394_v56 = vld [vmem:[%s4008_s22 + $0x44] sm:$0xf]  ;;  %v494_v62 = vrot.slane %v492_v44, 5  ;;  %s3219_s22 = sshll.u32 %s5276_s14, 5 }
  0x27   : > { %980 = vmatpush1.bf16.msra.mxu0 %v3732_v17  ;;  %v471_v17 = vrot.slane %v469_v7, 4  ;;  %v462_v52 = vrot.slane %v461_v30, 4  ;;  %v514_v59 = vshll.u32 %v4137_v55, 16  ;;  %v520_v60 = vshll.u32 %v394_v56, 16  ;;  %v3759_v3 = vld [vmem:[%s5209_s1 + $0xf0] ss:$8 sps:$4 sm:$0xff]   ;;  %s359_s15 = scalar_lea.vmem %s5218_s10, %s3219_s22 }
  0x28   : > { %981 = vmatprep.subr.bf16.mxu0 %v3733_v22  ;;  %v478_v22 = vshll.u32 %v388_v6, 16  ;;  %v2999_v1 = vcombine.low %v4115_v25, %v4137_v55  ;;  %v3760_v14 = vld [vmem:[%s5209_s1 + $0x100] ss:$8 sps:$4 sm:$0xff]   ;;  %v3772_v32 = vld [vmem:[%s5209_s1 + $0x134] ss:$8 sps:$4 sm:$0xff]  }
  0x29   : > { %v516_v7 = vrot.slane %v514_v59, 5  ;;  %v522_v8 = vrot.slane %v520_v60, 5  ;;  %v3788_v56 = vld [vmem:[%s5209_s1 + $0x190] ss:$8 sps:$4 sm:$0xff]   ;;  %v3797_v59 = vld [vmem:[%s5209_s1 + $0x1b4] ss:$8 sps:$4 sm:$0xff]  }
  0x2a   : > { %v480_v48 = vrot.slane %v478_v22, 5  ;;  %v3795_v60 = vld [vmem:[%s5209_s1 + $0x1b0] ss:$8 sps:$4 sm:$0xff]   ;;  %vm1384_vm6 = vsmask.f32 256 }
  0x2b   : > { %982 = vmatpush1.bf16.msra.mxu0 %v3735_v28  ;;  %v3753_v28 = vld [vmem:[%s5209_s1 + $0xd0] ss:$8 sps:$4 sm:$0xff]   ;;  %vm1385_vm7 = vsmask.f32 4368 }
  0x2c   : > { %983 = vmatprep.subr.bf16.mxu0 %v3736_v31  ;;  %v475_v31 = vor.u32 %v474_v18, %v471_v17  ;;  %v2988_v18 = vcombine.low %v4017_v13, %v4021_v15  ;;  %v3764_v13 = vld [vmem:[%s5209_s1 + $0x110] ss:$8 sps:$4 sm:$0xff]   ;;  %v361_v15 = vld [vmem:[%s5211_s3] sm:$0xff]  ;;  %vm4579_vm8 = vmor %vm1384_vm6, %vm1385_vm7 }
  0x2e   : > { %v476_v54 = vrot.slane %v475_v31, 4  ;;  %v3767_v31 = vld [vmem:[%s5209_s1 + $0x120] ss:$8 sps:$4 sm:$0xff]  }
  0x2f   : > { %984 = vmatpush1.bf16.msra.mxu0 %v3738_v40  ;;  %v500_v40 = vshll.u32 %v4115_v25, 16 }
  0x30   : > { %985 = vmatprep.subr.bf16.mxu0 %v3739_v42  ;;  %v488_v42 = vrot.slane %v486_v33, 5  ;;  %v4183_v30 = vsel %vm4046_vm2, %v476_v54, %v480_v48  ;;  %v2989_v33 = vcombine.low %v4038_v29, %v4079_v53  ;;  %v3784_v48 = vld [vmem:[%s5209_s1 + $0x174] ss:$8 sps:$4 sm:$0xff]   ;;  %v3785_v54 = vld [vmem:[%s5209_s1 + $0x180] ss:$8 sps:$4 sm:$0xff]   ;;  %v5231_v53 = vmov 0.0|0.0  }
  0x31   : > { %v362_v29 = vld [vmem:[%s5211_s3 + $0x8] sm:$0xff]  ;;  %3611 = vmatprep.subr.bf16.mxu1 %v5231_v53 }
  0x32   : > { %v489_v61 = vor.u32 %v488_v42, %v485_v41  ;;  %v3778_v41 = vld [vmem:[%s5209_s1 + $0x154] ss:$8 sps:$4 sm:$0xff]   ;;  %v2990_v42 = vcombine.low %v4091_v63, %v4095_v2 }
  0x33   : > { %986 = vmatpush1.bf16.msra.mxu0 %v3741_v45  ;;  %v506_v45 = vshll.u32 %v392_v26, 16  ;;  %v3769_v26 = vld [vmem:[%s5209_s1 + $0x124] ss:$8 sps:$4 sm:$0xff]   ;;  %v363_v63 = vld [vmem:[%s5211_s3 + $0x10] sm:$0xff]  ;;  %v364_v2 = vld [vmem:[%s5211_s3 + $0x18] sm:$0xff] }
  0x34   : > { %987 = vmatprep.subr.bf16.mxu0 %v3742_v47  ;;  %v466_v47 = vrot.slane %v464_v21, 5  ;;  %v490_v16 = vrot.slane %v489_v61, 4  ;;  %v3766_v21 = vld [vmem:[%s5209_s1 + $0x114] ss:$8 sps:$4 sm:$0xff]   ;;  %v3801_v61 = vld [vmem:[%s5209_s1 + $0x1c4] ss:$8 sps:$4 sm:$0xff]  }
  0x35   : > { %v508_v0 = vrot.slane %v506_v45, 5  ;;  %v3776_v45 = vld [vmem:[%s5209_s1 + $0x150] ss:$8 sps:$4 sm:$0xff]  }
  0x37   : > { %988 = vmatpush1.bf16.msra.mxu0 %v3744_v49  ;;  %v499_v49 = vrot.slane %v497_v39, 4  ;;  %v495_v39 = vsel %vm4046_vm2, %v490_v16, %v494_v62  ;;  %v3799_v62 = vld [vmem:[%s5209_s1 + $0x1c0] ss:$8 sps:$4 sm:$0xff]  }
  0x38   : > { %989 = vmatprep.subr.bf16.mxu0 %v3745_v50  ;;  %v502_v50 = vrot.slane %v500_v40, 5  ;;  %v3773_v40 = vld [vmem:[%s5209_s1 + $0x140] ss:$8 sps:$4 sm:$0xff]  }
  0x3b   : > { %990 = vmatpush1.bf16.msra.mxu0 %v3747_v57  ;;  %v503_v57 = vor.u32 %v502_v50, %v499_v49  ;;  %v2991_v49 = vcombine.low %v4111_v23, %v4115_v25  ;;  %v3000_v50 = vcombine.low %v4060_v43, %v439_v11  ;;  %v3790_v43 = vld [vmem:[%s5209_s1 + $0x194] ss:$8 sps:$4 sm:$0xff]   ;;  %v365_v23 = vld [vmem:[%s5211_s3 + $0x20] sm:$0xff]  ;;  %v366_v25 = vld [vmem:[%s5211_s3 + $0x28] sm:$0xff] }
  0x3c   : > { %991 = vmatprep.subr.bf16.mxu0 %v3748_v58  ;;  %v511_v58 = vshrl.u32 %v4137_v55, 16  ;;  %v367_v55 = vld [vmem:[%s5211_s3 + $0x30] sm:$0xff] }
  0x3d   : > { %v504_v4 = vrot.slane %v503_v57, 4  ;;  %v3794_v57 = vld [vmem:[%s5209_s1 + $0x1a4] ss:$8 sps:$4 sm:$0xff]  }
  0x3e   : > { %v513_v6 = vrot.slane %v511_v58, 4  ;;  %v3792_v58 = vld [vmem:[%s5209_s1 + $0x1a0] ss:$8 sps:$4 sm:$0xff]  }
  0x3f   : > { %992 = vmatpush1.bf16.msra.mxu0 %v3750_v9  ;;  %v3762_v9 = vld [vmem:[%s5209_s1 + $0x104] ss:$8 sps:$4 sm:$0xff]   ;;  %v509_v20 = vsel %vm4046_vm2, %v504_v4, %v508_v0  ;;  %v3804_v0 = vld [vmem:[%s5209_s1 + $0x1d4] ss:$8 sps:$4 sm:$0xff]  }
  0x40   : > { %993 = vmatprep.subr.bf16.mxu0 %v3751_v12  ;;  %v517_v10 = vor.u32 %v516_v7, %v513_v6  ;;  %v4154_v12 = vsel %vm4046_vm2, %v448_v37, %v452_v38  ;;  %v3770_v37 = vld [vmem:[%s5209_s1 + $0x130] ss:$8 sps:$4 sm:$0xff]   ;;  %v3775_v38 = vld [vmem:[%s5209_s1 + $0x144] ss:$8 sps:$4 sm:$0xff]   ;;  %v2995_v44 = vcombine.low %v495_v39, %v509_v20  ;;  %v3806_v6 = vld [vmem:[%s5209_s1 + $0x1e0] ss:$8 sps:$4 sm:$0xff]  }
  0x41   : > { %v2993_v19 = vcombine.low %v439_v11, %v4154_v12  ;;  %v3808_v4 = vld [vmem:[%s5209_s1 + $0x1e4] ss:$8 sps:$4 sm:$0xff]   ;;  %v3811_v7 = vld [vmem:[%s5209_s1 + $0x1f4] ss:$8 sps:$4 sm:$0xff]  }
  0x42   : > { %v518_v17 = vrot.slane %v517_v10, 4  ;;  %v3002_v10 = vcombine.low %v4183_v30, %v495_v39 }
  0x43   : > { %994 = vmatpush1.bf16.msra.mxu0 %v3753_v28  ;;  %v4179_v28 = vsel %vm4046_vm2, %v462_v52, %v466_v47  ;;  %v3779_v47 = vld [vmem:[%s5209_s1 + $0x160] ss:$8 sps:$4 sm:$0xff]   ;;  %v3787_v52 = vld [vmem:[%s5209_s1 + $0x184] ss:$8 sps:$4 sm:$0xff]  }
  0x44   : > { %995 = vmatprep.subr.bf16.mxu0 %v3754_v36  ;;  %v523_v22 = vsel %vm4046_vm2, %v518_v17, %v522_v8  ;;  %v2994_v36 = vcombine.low %v4179_v28, %v4183_v30  ;;  %v3809_v8 = vld [vmem:[%s5209_s1 + $0x1f0] ss:$8 sps:$4 sm:$0xff]  }
  0x45   : > { %v4169_v24 = vcombine.low %v509_v20, %v523_v22  ;;  %v371_v17 = vld [vmem:[%s5211_s3 + $0x50] sm:$0xff]  ;;  %v374_v20 = vld [vmem:[%s5211_s3 + $0x68] sm:$0xff] }
  0x47   : > { %996 = vmatpush1.bf16.msra.mxu0 %v3756_v46  ;;  %v3781_v46 = vld [vmem:[%s5209_s1 + $0x164] ss:$8 sps:$4 sm:$0xff]  }
  0x48   : > { %997 = vmatprep.subr.bf16.mxu0 %v3757_v51  ;;  %v3782_v51 = vld [vmem:[%s5209_s1 + $0x170] ss:$8 sps:$4 sm:$0xff]  }
  0x4b   : > { %998 = vmatpush1.bf16.msra.mxu0 %v3759_v3  ;;  %v3802_v3 = vld [vmem:[%s5209_s1 + $0x1d0] ss:$8 sps:$4 sm:$0xff]  }
  0x4c   : > { %1040 = vmatprep.subr.bf16.mxu0 %v3762_v9  ;;  %v3001_v9 = vcombine.low %v4154_v12, %v4179_v28  ;;  %v369_v12 = vld [vmem:[%s5211_s3 + $0x40] sm:$0xff]  ;;  %v5219_v28 = vmov 0.0  }
  0x4d   : > { %3514 = vmatprep.mubr.msk.f32.mxu1 %vm3903_vm3, %v5219_v28 }
  0x4e   : > { %1000 = vmatmul.mubr.bf16.vlgmr.msra.gmra.mrb[0].mxu0 %v2988_v18  ;;  %v372_v18 = vld [vmem:[%s5211_s3 + $0x58] sm:$0xff] }
  0x4f   : > { %1041 = vmatpush1.bf16.msra.mxu0 %v3760_v14  ;;  %1009 = vmatprep.mubr.bf16.mxu0 %v2993_v19  ;;  %v370_v14 = vld [vmem:[%s5211_s3 + $0x48] sm:$0xff]  ;;  %v373_v19 = vld [vmem:[%s5211_s3 + $0x60] sm:$0xff] }
  0x50   : > { %1042 = vmatprep.subr.bf16.mxu0 %v3766_v21  ;;  %v4340_v16 = vpack.c.bf16 %v370_v14, %v369_v12  ;;  %v4350_v21 = vpack.c.bf16 %v372_v18, %v371_v17  ;;  %v4360_v22 = vpack.c.bf16 %v374_v20, %v373_v19 }
  0x53   : > { %1043 = vmatpush1.bf16.msra.mxu0 %v3764_v13  ;;  %v376_v13 = vld [vmem:[%s5211_s3 + $0x78] sm:$0xff] }
  0x54   : > { %1044 = vmatprep.subr.bf16.mxu0 %v3769_v26 }
  0x56   : > { %1010 = vmatmul.mubr.bf16.gmra.mrb[4].mxu0 %v2989_v33 }
  0x57   : > { %1045 = vmatpush1.bf16.msra.mxu0 %v3767_v31  ;;  %1019 = vmatprep.mubr.bf16.mxu0 %v2994_v36 }
  0x58   : > { %1046 = vmatprep.subr.bf16.mxu0 %v3772_v32 }
  0x5b   : > { %1047 = vmatpush1.bf16.msra.mxu0 %v3770_v37 }
  0x5c   : > { %1048 = vmatprep.subr.bf16.mxu0 %v3775_v38 }
  0x5e   : > { %1020 = vmatmul.mubr.bf16.gmra.mrb[8].mxu0 %v2990_v42 }
  0x5f   : > { %1049 = vmatpush1.bf16.msra.mxu0 %v3773_v40  ;;  %1029 = vmatprep.mubr.bf16.mxu0 %v2995_v44 }
  0x60   : > { %1050 = vmatprep.subr.bf16.mxu0 %v3778_v41 }
  0x63   : > { %1051 = vmatpush1.bf16.msra.mxu0 %v3776_v45 }
  0x64   : > { %1052 = vmatprep.subr.bf16.mxu0 %v3781_v46 }
  0x66   : > { %1030 = vmatmul.mubr.bf16.gmra.mrb[12].mxu0 %v2991_v49 }
  0x67   : > { %1053 = vmatpush1.bf16.msra.mxu0 %v3779_v47  ;;  %1072 = vmatprep.mubr.bf16.mxu0 %v3000_v50 }
  0x68   : > { %1054 = vmatprep.subr.bf16.mxu0 %v3784_v48 }
  0x6b   : > { %1055 = vmatpush1.bf16.msra.mxu0 %v3782_v51 }
  0x6c   : > { %1056 = vmatprep.subr.bf16.mxu0 %v3787_v52 }
  0x6f   : > { %1057 = vmatpush1.bf16.msra.mxu0 %v3785_v54 }
  0x70   : > { %1058 = vmatprep.subr.bf16.mxu0 %v3790_v43 }
  0x73   : > { %1059 = vmatpush1.bf16.msra.mxu0 %v3788_v56 }
  0x74   : > { %1060 = vmatprep.subr.bf16.mxu0 %v3794_v57 }
  0x77   : > { %1061 = vmatpush1.bf16.msra.mxu0 %v3792_v58 }
  0x78   : > { %1062 = vmatprep.subr.bf16.mxu0 %v3797_v59 }
  0x7b   : > { %1063 = vmatpush1.bf16.msra.mxu0 %v3795_v60 }
  0x7c   : > { %1064 = vmatprep.subr.bf16.mxu0 %v3801_v61 }
  0x7f   : > { %1065 = vmatpush1.bf16.msra.mxu0 %v3799_v62 }
  0x80   : > { %1066 = vmatprep.subr.bf16.mxu0 %v3804_v0 }
  0x83   : > { %1067 = vmatpush1.bf16.msra.mxu0 %v3802_v3 }
  0x84   : > { %1068 = vmatprep.subr.bf16.mxu0 %v3808_v4 }
  0x87   : > { %1069 = vmatpush1.bf16.msra.mxu0 %v3806_v6 }
  0x88   : > { %1070 = vmatprep.subr.bf16.mxu0 %v3811_v7 }
  0x8b   : > { %1071 = vmatpush1.bf16.msra.mxu0 %v3809_v8 }
  0x8e   : > { %1073 = vmatmul.mubr.bf16.vlgmr.msra.gmra.mrb[0].mxu0 %v2996_v34  ;;  %v4299_v34 = vpack.c.bf16 %v362_v29, %v361_v15 }
  0x8f   : > { %1082 = vmatprep.mubr.bf16.mxu0 %v3001_v9 }
  0x90   : > { %3613 = vmatpush3.bf16.msra.mxu1 %v4299_v34 }
  0x91   : > { %3614 = vmatprep.subr.bf16.mxu1 %v5231_v53 }
  0x96   : > { %1083 = vmatmul.mubr.bf16.gmra.mrb[4].mxu0 %v2997_v5  ;;  %v4310_v5 = vpack.c.bf16 %v364_v2, %v363_v63 }
  0x97   : > { %1092 = vmatprep.mubr.bf16.mxu0 %v3002_v10 }
  0x98   : > { %3616 = vmatpush3.bf16.msra.mxu1 %v4310_v5 }
  0x99   : > { %3617 = vmatprep.subr.bf16.mxu1 %v5231_v53 }
  0x9e   : > { %1093 = vmatmul.mubr.bf16.gmra.mrb[8].mxu0 %v2998_v27  ;;  %v4320_v27 = vpack.c.bf16 %v366_v25, %v365_v23 }
  0x9f   : > { %1102 = vmatprep.mubr.bf16.mxu0 %v4169_v24  ;;  %v375_v24 = vld [vmem:[%s5211_s3 + $0x70] sm:$0xff] }
  0xa0   : > { %3619 = vmatpush3.bf16.msra.mxu1 %v4320_v27  ;;  %v4370_v26 = vpack.c.bf16 %v376_v13, %v375_v24 }
  0xa1   : > { %3620 = vmatprep.subr.bf16.mxu1 %v5231_v53 }
  0xa6   : > { %1103 = vmatmul.mubr.bf16.gmra.mrb[12].mxu0 %v2999_v1  ;;  %v368_v1 = vld [vmem:[%s5211_s3 + $0x38] sm:$0xff] }
  0xa7   : > { %v4330_v11 = vpack.c.bf16 %v368_v1, %v367_v55 }
  0xa9   : > { %3622 = vmatpush3.bf16.msra.mxu1 %v4330_v11 }
  0xaa   : > { %3623 = vmatprep.subr.bf16.mxu1 %v5231_v53 }
  0xad   : > { %3625 = vmatpush3.bf16.msra.mxu1 %v4340_v16 }
  0xae   : > { %3626 = vmatprep.subr.bf16.mxu1 %v5231_v53 }
  0xb1   : > { %3628 = vmatpush3.bf16.msra.mxu1 %v4350_v21 }
  0xb2   : > { %3629 = vmatprep.subr.bf16.mxu1 %v5231_v53 }
  0xb5   : > { %3631 = vmatpush3.bf16.msra.mxu1 %v4360_v22 }
  0xb6   : > { %3632 = vmatprep.subr.bf16.mxu1 %v5231_v53 }
  0xb9   : > { %3634 = vmatpush3.bf16.msra.mxu1 %v4370_v26 }
 0x161   : > { %v4375_v30 = vpop.f32.mrb[0].mxu0 }
 0x162   : > { %v4377_v31 = vpop.f32.mrb[1].mxu0  ;;  %v1126_v33 = vmul.f32 %v4375_v30, %v4375_v30 }
 0x163   : > { %v4379_v32 = vpop.f32.mrb[2].mxu0  ;;  %v2714_v39 = vmul.f32 %v4377_v31, %v4377_v31 }
 0x164   : > { %v1113_v36 = vadd.f32 %v4379_v32, %v4375_v30  ;;  %v1127_v37 = vmul.f32 %v4379_v32, %v4379_v32  ;;  %v4387_v38 = vpop.f32.mrb[3].mxu0 }
 0x165   : > { %v2701_v40 = vadd.f32 %v4387_v38, %v4377_v31  ;;  %v2715_v41 = vmul.f32 %v4387_v38, %v4387_v38 }
 0x166   : > { %v1134_v42 = vadd.f32 %v1127_v37, %v1126_v33 }
 0x167   : > { %v2722_v44 = vadd.f32 %v2715_v41, %v2714_v39 }
 0x169   : > { %v4395_v45 = vpop.f32.mrb[4].mxu0 }
 0x16a   : > { %v1114_v46 = vadd.f32 %v1113_v36, %v4395_v45  ;;  %v1128_v47 = vmul.f32 %v4395_v45, %v4395_v45  ;;  %v4400_v48 = vpop.f32.mrb[5].mxu0 }
 0x16b   : > { %v2702_v49 = vadd.f32 %v2701_v40, %v4400_v48  ;;  %v2716_v50 = vmul.f32 %v4400_v48, %v4400_v48  ;;  %v4405_v51 = vpop.f32.mrb[6].mxu0 }
 0x16c   : > { %v1135_v52 = vadd.f32 %v1134_v42, %v1128_v47  ;;  %v1115_v54 = vadd.f32 %v1114_v46, %v4405_v51  ;;  %v1129_v43 = vmul.f32 %v4405_v51, %v4405_v51  ;;  %v4410_v56 = vpop.f32.mrb[7].mxu0 }
 0x16d   : > { %5242 = vst [vmem:[#allocation2_spill] sm:$0xff] %v4410_v56  ;;  %v2723_v57 = vadd.f32 %v2722_v44, %v2716_v50  ;;  %v2703_v58 = vadd.f32 %v2702_v49, %v4410_v56  ;;  %v2717_v59 = vmul.f32 %v4410_v56, %v4410_v56 }
 0x16e   : > { %v1136_v60 = vadd.f32 %v1135_v52, %v1129_v43 }
 0x16f   : > { %v2724_v61 = vadd.f32 %v2723_v57, %v2717_v59 }
 0x171   : > { %v4415_v62 = vpop.f32.mrb[8].mxu0 }
 0x172   : > { %v1116_v0 = vadd.f32 %v1115_v54, %v4415_v62  ;;  %v1130_v3 = vmul.f32 %v4415_v62, %v4415_v62  ;;  %v4420_v4 = vpop.f32.mrb[9].mxu0 }
 0x173   : > { %5243 = vst [vmem:[#allocation3_spill] sm:$0xff] %v4420_v4  ;;  %v2704_v6 = vadd.f32 %v2703_v58, %v4420_v4  ;;  %v2718_v7 = vmul.f32 %v4420_v4, %v4420_v4  ;;  %v4425_v8 = vpop.f32.mrb[10].mxu0 }
 0x174   : > { %v1137_v9 = vadd.f32 %v1136_v60, %v1130_v3  ;;  %v1117_v10 = vadd.f32 %v1116_v0, %v4425_v8  ;;  %v1131_v15 = vmul.f32 %v4425_v8, %v4425_v8  ;;  %v4430_v29 = vpop.f32.mrb[11].mxu0 }
 0x175   : > { %5244 = vst [vmem:[#allocation4_spill] sm:$0xff] %v4430_v29  ;;  %v2725_v63 = vadd.f32 %v2724_v61, %v2718_v7  ;;  %v2705_v2 = vadd.f32 %v2704_v6, %v4430_v29  ;;  %v2719_v23 = vmul.f32 %v4430_v29, %v4430_v29 }
 0x176   : > { %v1138_v25 = vadd.f32 %v1137_v9, %v1131_v15 }
 0x177   : > { %v2726_v55 = vadd.f32 %v2725_v63, %v2719_v23 }
 0x179   : > { %v4435_v1 = vpop.f32.mrb[12].mxu0 }
 0x17a   : > { %v1118_v12 = vadd.f32 %v1117_v10, %v4435_v1  ;;  %v1132_v14 = vmul.f32 %v4435_v1, %v4435_v1  ;;  %v4440_v17 = vpop.f32.mrb[13].mxu0 }
 0x17b   : > { %5245 = vst [vmem:[#allocation5_spill] sm:$0xff] %v4440_v17  ;;  %v2706_v18 = vadd.f32 %v2705_v2, %v4440_v17  ;;  %v2720_v19 = vmul.f32 %v4440_v17, %v4440_v17  ;;  %v4445_v20 = vpop.f32.mrb[14].mxu0 }
 0x17c   : > { %v1139_v24 = vadd.f32 %v1138_v25, %v1132_v14  ;;  %v1119_v13 = vadd.f32 %v1118_v12, %v4445_v20  ;;  %v1133_v33 = vmul.f32 %v4445_v20, %v4445_v20  ;;  %v4450_v36 = vpop.f32.mrb[15].mxu0  ;;  %v3816_v14 = vld [vmem:[%s5210_s2 + $0x40] sm:$0xff]  }
 0x17d   : > { %5246 = vst [vmem:[#allocation6_spill] sm:$0xff] %v4450_v36  ;;  %v2727_v37 = vadd.f32 %v2726_v55, %v2720_v19  ;;  %v2707_v39 = vadd.f32 %v2706_v18, %v4450_v36  ;;  %v2721_v40 = vmul.f32 %v4450_v36, %v4450_v36  ;;  %v3817_v18 = vld [vmem:[%s5210_s2] sm:$0xff]   ;;  %3276 = vmatprep.subr.bf16.mxu1 %v3816_v14 }
 0x17e   : > { %v1120_v41 = vrot.slane %v1119_v13, 4  ;;  %v1140_v42 = vadd.f32 %v1139_v24, %v1133_v33  ;;  %v3818_v19 = vld [vmem:[%s5210_s2 + $0x1c0] sm:$0xff]   ;;  %v3821_v33 = vld [vmem:[%s5210_s2 + $0x8] sm:$0xff]  }
 0x17f   : > { %v2708_v44 = vrot.slane %v2707_v39, 4  ;;  %v2728_v46 = vadd.f32 %v2727_v37, %v2721_v40  ;;  %v3819_v24 = vld [vmem:[%s5210_s2 + $0x180] sm:$0xff]   ;;  %3396 = vmatprep.subr.bf16.mxu0 %v3818_v19  ;;  %v3822_v37 = vld [vmem:[%s5210_s2 + $0x1c8] sm:$0xff]   ;;  %v3824_v40 = vld [vmem:[%s5210_s2 + $0x50] sm:$0xff]  }
 0x180   : > { %v1121_v47 = vadd.f32 %v1120_v41, %v1119_v13  ;;  %v1141_v49 = vrot.slane %v1140_v42, 4  ;;  %3397 = vmatpush3.bf16.msra.mxu0 %v3819_v24  ;;  %v3820_v13 = vld [vmem:[%s5210_s2 + $0x48] sm:$0xff]   ;;  %v3825_v41 = vld [vmem:[%s5210_s2 + $0x10] sm:$0xff]  }
 0x181   : > { %v2709_v50 = vadd.f32 %v2708_v44, %v2707_v39  ;;  %v2729_v52 = vrot.slane %v2728_v46, 4  ;;  %v3823_v39 = vld [vmem:[%s5210_s2 + $0x188] sm:$0xff]   ;;  %3398 = vmatprep.subr.bf16.mxu0 %v3822_v37  ;;  %v3827_v44 = vld [vmem:[%s5210_s2 + $0x190] sm:$0xff]  }
 0x182   : > { %v1122_v54 = vrot.slane %v1121_v47, 2  ;;  %v1142_v43 = vadd.f32 %v1141_v49, %v1140_v42  ;;  %v3826_v42 = vld [vmem:[%s5210_s2 + $0x1d0] sm:$0xff]   ;;  %v3830_v49 = vld [vmem:[%s5210_s2 + $0x1d8] sm:$0xff]  }
 0x183   : > { %v2710_v57 = vrot.slane %v2709_v50, 2  ;;  %v2730_v58 = vadd.f32 %v2729_v52, %v2728_v46  ;;  %v3828_v46 = vld [vmem:[%s5210_s2 + $0x58] sm:$0xff]   ;;  %v3832_v52 = vld [vmem:[%s5210_s2 + $0x60] sm:$0xff]  }
 0x184   : > { %v1123_v59 = vadd.f32 %v1122_v54, %v1121_v47  ;;  %v1143_v60 = vrot.slane %v1142_v43, 2  ;;  %3399 = vmatpush3.bf16.msra.mxu0 %v3823_v39  ;;  %v3829_v47 = vld [vmem:[%s5210_s2 + $0x18] sm:$0xff]   ;;  %v3834_v54 = vld [vmem:[%s5210_s2 + $0x1e0] sm:$0xff]  }
 0x185   : > { %v2711_v61 = vadd.f32 %v2710_v57, %v2709_v50  ;;  %v2731_v0 = vrot.slane %v2730_v58, 2  ;;  %3400 = vmatprep.subr.bf16.mxu0 %v3826_v42  ;;  %v3831_v50 = vld [vmem:[%s5210_s2 + $0x198] sm:$0xff]   ;;  %v3835_v57 = vld [vmem:[%s5210_s2 + $0x1a0] sm:$0xff]  }
 0x186   : > { %v1124_v3 = vrot.slane %v1123_v59, 1  ;;  %v1144_v6 = vadd.f32 %v1143_v60, %v1142_v43  ;;  %v3833_v43 = vld [vmem:[%s5210_s2 + $0x20] sm:$0xff]   ;;  %v3837_v60 = vld [vmem:[%s5210_s2 + $0x28] sm:$0xff]  }
 0x187   : > { %v2712_v7 = vrot.slane %v2711_v61, 1  ;;  %v2732_v9 = vadd.f32 %v2731_v0, %v2730_v58  ;;  %v3836_v58 = vld [vmem:[%s5210_s2 + $0x68] sm:$0xff]   ;;  %v3840_v0 = vld [vmem:[%s5210_s2 + $0x70] sm:$0xff]  }
 0x188   : > { %v1145_v10 = vrot.slane %v1144_v6, 1  ;;  %v1125_v63 = vadd.f32 %v1124_v3, %v1123_v59  ;;  %3401 = vmatpush3.bf16.msra.mxu0 %v3827_v44  ;;  %v3838_v59 = vld [vmem:[%s5210_s2 + $0x1e8] sm:$0xff]   ;;  %v3841_v3 = vld [vmem:[%s5210_s2 + $0x30] sm:$0xff]  }
 0x189   : > { %v2733_v15 = vrot.slane %v2732_v9, 1  ;;  %v2713_v23 = vadd.f32 %v2712_v7, %v2711_v61  ;;  %3402 = vmatprep.subr.bf16.mxu0 %v3830_v49  ;;  %v3839_v61 = vld [vmem:[%s5210_s2 + $0x1a8] sm:$0xff]   ;;  %v3843_v7 = vld [vmem:[%s5210_s2 + $0x1b0] sm:$0xff]  }
 0x18a   : > { %v1146_v2 = vadd.f32 %v1145_v10, %v1144_v6  ;;  %v3842_v6 = vld [vmem:[%s5210_s2 + $0x1f0] sm:$0xff]   ;;  %v3845_v10 = vld [vmem:[%s5210_s2 + $0x38] sm:$0xff]  }
 0x18b   : > { %v2734_v25 = vadd.f32 %v2733_v15, %v2732_v9  ;;  %v3844_v9 = vld [vmem:[%s5210_s2 + $0x78] sm:$0xff]  }
 0x18c   : > { %v1148_v55 = vsel %vm1147_vm4, %v1125_v63, %v1146_v2  ;;  %3403 = vmatpush3.bf16.msra.mxu0 %v3831_v50  ;;  %v3846_v15 = vld [vmem:[%s5210_s2 + $0x1f8] sm:$0xff]   ;;  %v3848_v2 = vld [vmem:[%s5210_s2 + $0xc0] sm:$0xff]  }
 0x18d   : > { %3515 = vmatmul.mubr.f32.vlgmr.msra.gmra.mrb[0].mxu1 %v1148_v55  ;;  %v4457_v12 = vsel %vm1147_vm4, %v2713_v23, %v2734_v25  ;;  %3404 = vmatprep.subr.bf16.mxu0 %v3834_v54  ;;  %v3847_v63 = vld [vmem:[%s5210_s2 + $0x1b8] sm:$0xff]   ;;  %v1228_v23 = vlaneseq }
 0x18e   : > { %3277 = vmatpush3.bf16.msra.mxu1 %v3817_v18  ;;  %v3905_v18 = vmov 0  }
 0x18f   : > { %3278 = vmatprep.subr.bf16.mxu1 %v3820_v13  ;;  %v1229_v25 = vshrl.u32 %v1228_v23, 7  ;;  %v1315_v19 = vrot.slane %v3905_v18, 4 }
 0x190   : > { %3405 = vmatpush3.bf16.msra.mxu0 %v3835_v57 }
 0x191   : > { %3406 = vmatprep.subr.bf16.mxu0 %v3838_v59  ;;  %v4559_v55 = vsub.s32 0, %v1229_v25  ;;  %v4563_v39 = vsel %vm1324_vm5, 0, %v1315_v19 }
 0x192   : > { %3279 = vmatpush3.bf16.msra.mxu1 %v3821_v33  ;;  %v3079_v57 = vcombine.high %v4563_v39, %v4563_v39 }
 0x193   : > { %3280 = vmatprep.subr.bf16.mxu1 %v3824_v40 }
 0x194   : > { %3407 = vmatpush3.bf16.msra.mxu0 %v3839_v61  ;;  %v1396_v59 = vshll.u32 %v3079_v57, 16 }
 0x195   : > { %3408 = vmatprep.subr.bf16.mxu0 %v3842_v6  ;;  %v3068_v6 = vld [vmem:[%s5212_s4] ss:$0 sm:$0xff] }
 0x196   : > { %3281 = vmatpush3.bf16.msra.mxu1 %v3825_v41 }
 0x197   : > { %3282 = vmatprep.subr.bf16.mxu1 %v3828_v46 }
 0x198   : > { %3409 = vmatpush3.bf16.msra.mxu0 %v3843_v7 }
 0x199   : > { %3410 = vmatprep.subr.bf16.mxu0 %v3846_v15 }
 0x19a   : > { %3283 = vmatpush3.bf16.msra.mxu1 %v3829_v47 }
 0x19b   : > { %3284 = vmatprep.subr.bf16.mxu1 %v3832_v52 }
 0x19c   : > { %3411 = vmatpush3.bf16.msra.mxu0 %v3847_v63 }
 0x19d   : > { %3635 = vmatprep.subr.bf16.mxu0 %v5231_v53 }
 0x19e   : > { %3285 = vmatpush3.bf16.msra.mxu1 %v3833_v43 }
 0x19f   : > { %3286 = vmatprep.subr.bf16.mxu1 %v3836_v58  ;;  %v3102_v58 = vcombine.low %v3905_v18, %v3905_v18 }
 0x1a2   : > { %3287 = vmatpush3.bf16.msra.mxu1 %v3837_v60 }
 0x1a3   : > { %3288 = vmatprep.subr.bf16.mxu1 %v3840_v0 }
 0x1a6   : > { %3289 = vmatpush3.bf16.msra.mxu1 %v3841_v3 }
 0x1a7   : > { %3290 = vmatprep.subr.bf16.mxu1 %v3844_v9  ;;  %v4589_v9 = vrot.slane %v1396_v59, 5 }
 0x1aa   : > { %3291 = vmatpush3.bf16.msra.mxu1 %v3845_v10 }
 0x1ab   : > { %3316 = vmatprep.subr.bf16.mxu1 %v3848_v2 }
 0x260   : > { %v1215_v14 = vpop.f32.mrb[0].mxu1 }
 0x261   : > { %v1219_v24 = vmul.f32 0.0078125, %v1215_v14  ;;  %v3516_v13 = vpop.f32.mrb[1].mxu1  ;;  %v3069_v14 = vld [vmem:[%s5213_s5] ss:$0 sm:$0xff] }
 0x263   : > { %v1220_v33 = vmul.f32 %v1219_v24, %v1219_v24  ;;  %v1231_v37 = vrot.slane %v1219_v24, %v4559_v55 }
 0x265   : > { %v1222_v40 = vrot.slane %v1220_v33, 7  ;;  %v1232_v41 = vsub.f32 %v4375_v30, %v1231_v37  ;;  %v1233_v42 = vsub.f32 %v4379_v32, %v1231_v37  ;;  %v1234_v44 = vsub.f32 %v4395_v45, %v1231_v37 }
 0x266   : > { %v1235_v46 = vsub.f32 %v4405_v51, %v1231_v37  ;;  %v1236_v47 = vsub.f32 %v4415_v62, %v1231_v37  ;;  %v1237_v49 = vsub.f32 %v4425_v8, %v1231_v37  ;;  %v1238_v50 = vsub.f32 %v4435_v1, %v1231_v37 }
 0x267   : > { %v1224_v52 = vsub.f32 %v1219_v24, %v1222_v40  ;;  %v1239_v54 = vsub.f32 %v4445_v20, %v1231_v37  ;;  %v3078_v32 = vcombine.low %v4563_v39, %v4563_v39  ;;  %v1393_v45 = vshrl.u32 %v3079_v57, 16 }
 0x268   : > { %v4577_v8 = vsub.s32 1, %v1229_v25  ;;  %v1498_v1 = vshll.u32 %v3102_v58, 16 }
 0x269   : > { %v1225_v43 = vmax.f32 %v1224_v52, 0.0  ;;  %v1388_v51 = vshrl.u32 %v3078_v32, 16  ;;  %v1395_v62 = vrot.slane %v1393_v45, 7  ;;  %v4587_v7 = vrot.slane %v1393_v45, 4 }
 0x26a   : > { %5247 = vst [vmem:[#allocation7_spill] sm:$0xff] %v4577_v8  ;;  %v4591_v10 = vrot.slane %v1498_v1, 5 }
 0x26b   : > { %v1226_v30 = vadd.f32 1e-05, %v1225_v43  ;;  %v3094_v20 = vrot.slane %v1388_v51, 11  ;;  %v1398_v60 = vor.u32 %v1396_v59, %v1395_v62 }
 0x26d   : > { %3888 = vrsqrt.f32 %v1226_v30  ;;  %v4595_v15 = vsel %vm4579_vm8, %v3094_v20, %v1398_v60 }
 0x277   : > { %v3889_v0 = vpop.eup %3888 }
 0x278   : > { %v1243_v3 = vrot.slane %v3889_v0, %v4577_v8 }
 0x27a   : > { %v1244_v63 = vmul.f32 %v1243_v3, %v1232_v41  ;;  %v1245_v2 = vmul.f32 %v1243_v3, %v1233_v42  ;;  %v1246_v23 = vmul.f32 %v1243_v3, %v1234_v44  ;;  %v1247_v25 = vmul.f32 %v1243_v3, %v1235_v46 }
 0x27b   : > { %v1248_v18 = vmul.f32 %v1243_v3, %v1236_v47  ;;  %v1249_v19 = vmul.f32 %v1243_v3, %v1237_v49  ;;  %v1250_v24 = vmul.f32 %v1243_v3, %v1238_v50  ;;  %v1251_v13 = vmul.f32 %v1243_v3, %v1239_v54 }
 0x27c   : > { %v1259_v33 = vmul.f32 %v3068_v6, %v1244_v63  ;;  %v1260_v37 = vmul.f32 %v3068_v6, %v1245_v2  ;;  %v1261_v40 = vmul.f32 %v3068_v6, %v1246_v23  ;;  %v1262_v52 = vmul.f32 %v3068_v6, %v1247_v25 }
 0x27d   : > { %v1263_v43 = vmul.f32 %v3068_v6, %v1248_v18  ;;  %v1264_v57 = vmul.f32 %v3068_v6, %v1249_v19  ;;  %v1265_v30 = vmul.f32 %v3068_v6, %v1250_v24  ;;  %v1266_v32 = vmul.f32 %v3068_v6, %v1251_v13 }
 0x27e   : > { %v1274_v41 = vadd.f32 %v3069_v14, %v1259_v33  ;;  %v1275_v42 = vadd.f32 %v3069_v14, %v1260_v37  ;;  %v1276_v44 = vadd.f32 %v3069_v14, %v1261_v40  ;;  %v1277_v46 = vadd.f32 %v3069_v14, %v1262_v52 }
 0x27f   : > { %v1278_v45 = vadd.f32 %v3069_v14, %v1263_v43  ;;  %v1279_v51 = vadd.f32 %v3069_v14, %v1264_v57  ;;  %v1280_v58 = vadd.f32 %v3069_v14, %v1265_v30  ;;  %v1281_v62 = vadd.f32 %v3069_v14, %v1266_v32 }
 0x280   : > { %v1282_v47 = vmax.f32 %v1274_v41, 0.0  ;;  %v1283_v49 = vmax.f32 %v1275_v42, 0.0  ;;  %v1284_v50 = vmax.f32 %v1276_v44, 0.0  ;;  %v1285_v54 = vmax.f32 %v1277_v46, 0.0 }
 0x281   : > { %v1286_v59 = vmax.f32 %v1278_v45, 0.0  ;;  %v1287_v1 = vmax.f32 %v1279_v51, 0.0  ;;  %v1288_v20 = vmax.f32 %v1280_v58, 0.0  ;;  %v1289_v60 = vmax.f32 %v1281_v62, 0.0 }
 0x282   : > { %v3220_v0 = vpack.c.bf16 %v1282_v47, %v1282_v47  ;;  %v3221_v3 = vpack.c.bf16 %v1283_v49, %v1283_v49  ;;  %v3222_v63 = vpack.c.bf16 %v1284_v50, %v1284_v50  ;;  %v3223_v2 = vpack.c.bf16 %v1285_v54, %v1285_v54 }
 0x283   : > { %v3224_v23 = vpack.c.bf16 %v1286_v59, %v1286_v59  ;;  %v3225_v25 = vpack.c.bf16 %v1287_v1, %v1287_v1  ;;  %v3226_v18 = vpack.c.bf16 %v1288_v20, %v1288_v20  ;;  %v4611_v13 = vpack.c.bf16 %v1289_v60, %v1289_v60 }
 0x284   : > { %v4603_v14 = vsel %vm1324_vm5, 0, %v3220_v0  ;;  %v4606_v19 = vsel %vm1324_vm5, 0, %v3221_v3  ;;  %v4609_v24 = vsel %vm1324_vm5, 0, %v3222_v63  ;;  %v4634_v46 = vsel %vm1324_vm5, 0, %v3223_v2 }
 0x285   : > { %v3080_v33 = vcombine.low %v4603_v14, %v4603_v14  ;;  %v3081_v37 = vcombine.high %v4603_v14, %v4603_v14  ;;  %v3110_v40 = vcombine.high %v4563_v39, %v4603_v14  ;;  %v3082_v52 = vcombine.low %v4606_v19, %v4606_v19 }
 0x286   : > { %v4623_v43 = vcombine.high %v4606_v19, %v4606_v19  ;;  %v3084_v57 = vcombine.low %v4609_v24, %v4609_v24  ;;  %v4629_v30 = vcombine.high %v4609_v24, %v4609_v24  ;;  %v3111_v32 = vcombine.high %v4606_v19, %v4609_v24 }
 0x287   : > { %v1401_v41 = vshrl.u32 %v3080_v33, 16  ;;  %v1406_v42 = vshrl.u32 %v3081_v37, 16  ;;  %2240 = vmatprep.mubr.bf16.mxu1 %v3110_v40  ;;  %v1414_v44 = vshrl.u32 %v3082_v52, 16  ;;  %v1409_v45 = vshll.u32 %v3081_v37, 16 }
 0x288   : > { %v1419_v51 = vshrl.u32 %v4623_v43, 16  ;;  %v1427_v58 = vshrl.u32 %v3084_v57, 16  ;;  %v5223_v62 = vshrl.u32 %v4629_v30, 16  ;;  %2435 = vmatprep.mubr.bf16.mxu0 %v3111_v32  ;;  %v5225_v50 = vshll.u32 %v4623_v43, 16 }
 0x289   : > { %v4638_v47 = vrot.slane %v1406_v42, 4  ;;  %v3096_v49 = vrot.slane %v1414_v44, 11  ;;  %v5222_v54 = vshll.u32 %v4629_v30, 16  ;;  %v3095_v60 = vrot.slane %v1401_v41, 11 }
 0x28a   : > { %v1421_v59 = vrot.slane %v1419_v51, 7  ;;  %v3097_v1 = vrot.slane %v1427_v58, 11  ;;  %v1434_v20 = vrot.slane %v5223_v62, 7  ;;  %v1408_v0 = vrot.slane %v1406_v42, 7 }
 0x28b   : > { %v4645_v3 = vsel %vm1324_vm5, 0, %v3224_v23  ;;  %v4649_v63 = vcombine.high %v4634_v46, %v4634_v46  ;;  %v3086_v2 = vcombine.low %v4634_v46, %v4634_v46  ;;  %v4668_v44 = vrot.slane %v1409_v45, 5 }
 0x28c   : > { %v1424_v33 = vor.u32 %v5225_v50, %v1421_v59  ;;  %v1437_v37 = vor.u32 %v5222_v54, %v1434_v20  ;;  %v4659_v40 = vcombine.high %v4645_v3, %v4645_v3  ;;  %v4663_v23 = vcombine.high %v4634_v46, %v4645_v3 }
 0x28d   : > { %v1411_v52 = vor.u32 %v1409_v45, %v1408_v0  ;;  %v3088_v57 = vcombine.low %v4645_v3, %v4645_v3  ;;  %v1440_v41 = vshrl.u32 %v3086_v2, 16  ;;  %v5221_v42 = vshrl.u32 %v4649_v63, 16  ;;  %v3849_v2 = vld [vmem:[%s5210_s2 + $0x80] sm:$0xff]  }
 0x28e   : > { %v4672_v58 = vsel %vm4579_vm8, %v3096_v49, %v1424_v33  ;;  %v4676_v59 = vsel %vm4579_vm8, %v3097_v1, %v1437_v37  ;;  %v5224_v20 = vshrl.u32 %v4659_v40, 16  ;;  %v5227_v33 = vshll.u32 %v4649_v63, 16 }
 0x28f   : > { %v4681_v0 = vsel %vm4579_vm8, %v3095_v60, %v1411_v52  ;;  %v3107_v45 = vcombine.low %v4672_v58, %v4676_v59  ;;  %v1447_v49 = vrot.slane %v5221_v42, 7  ;;  %v3850_v60 = vld [vmem:[%s5210_s2 + $0xc8] sm:$0xff]   ;;  %v1453_v37 = vshrl.u32 %v3088_v57, 16 }
 0x290   : > { %v3106_v1 = vcombine.low %v4595_v15, %v4681_v0  ;;  %v1460_v52 = vrot.slane %v5224_v20, 7  ;;  %v5226_v28 = vshll.u32 %v4659_v40, 16  ;;  %v3098_v6 = vrot.slane %v1440_v41, 11 }
 0x291   : > { %2436 = vmatmul.mubr.bf16.vlgmr.msra.gmra.mrb[16].mxu0 %v3107_v45  ;;  %v1450_v42 = vor.u32 %v5227_v33, %v1447_v49  ;;  %v4702_v54 = vsel %vm1324_vm5, 0, %v3225_v25  ;;  %v4705_v62 = vsel %vm1324_vm5, 0, %v3226_v18  ;;  %v3099_v57 = vrot.slane %v1453_v37, 11  ;;  %v3851_v25 = vld [vmem:[%s5210_s2 + $0x88] sm:$0xff]  }
 0x292   : > { %2241 = vmatmul.mubr.bf16.vlgmr.msra.gmra.mrb[4].mxu1 %v3106_v1  ;;  %2443 = vmatprep.mubr.bf16.mxu0 %v4663_v23  ;;  %v1463_v20 = vor.u32 %v5226_v28, %v1460_v52  ;;  %v4712_v50 = vcombine.high %v4702_v54, %v4702_v54  ;;  %v4716_v41 = vcombine.high %v4705_v62, %v4705_v62  ;;  %v4733_v37 = vsel %vm1324_vm5, 0, %v4611_v13 }
 0x293   : > { %3317 = vmatpush3.bf16.msra.mxu1 %v3849_v2  ;;  %2248 = vmatprep.mubr.bf16.mxu1 %v3111_v32  ;;  %v4723_v18 = vsel %vm4579_vm8, %v3098_v6, %v1450_v42  ;;  %v4727_v49 = vcombine.high %v4702_v54, %v4705_v62  ;;  %v3090_v1 = vcombine.low %v4702_v54, %v4702_v54  ;;  %v3852_v32 = vld [vmem:[%s5210_s2 + $0xd0] sm:$0xff]   ;;  %v1507_v52 = vrot.slane %v1419_v51, 4 }
 0x294   : > { %3318 = vmatprep.subr.bf16.mxu1 %v3850_v60  ;;  %v4740_v6 = vsel %vm4579_vm8, %v3099_v57, %v1463_v20  ;;  %v3092_v42 = vcombine.low %v4705_v62, %v4705_v62  ;;  %v5233_v2 = vshrl.u32 %v4712_v50, 16  ;;  %3637 = vmatpush3.bf16.msra.mxu0 %v4299_v34  ;;  %v5236_v33 = vshrl.u32 %v4716_v41, 16 }
 0x295   : > { %v4748_v13 = vcombine.low %v4723_v18, %v4740_v6  ;;  %v1466_v60 = vshrl.u32 %v3090_v1, 16  ;;  %3638 = vmatprep.subr.bf16.mxu0 %v5231_v53  ;;  %v4758_v51 = vcombine.high %v4733_v37, %v4733_v37  ;;  %v3853_v1 = vld [vmem:[%s5210_s2 + $0x90] sm:$0xff]   ;;  %v3103_v53 = vcombine.low %v4733_v37, %v4733_v37 }
 0x296   : > { %v1473_v20 = vrot.slane %v5233_v2, 7  ;;  %v1479_v57 = vshrl.u32 %v3092_v42, 16  ;;  %v1486_v36 = vrot.slane %v5236_v33, 7  ;;  %v3854_v2 = vld [vmem:[%s5210_s2 + $0xd8] sm:$0xff]   ;;  %v5251_v33 = vshll.u32 %v4716_v41, 16 }
 0x297   : > { %3319 = vmatpush3.bf16.msra.mxu1 %v3851_v25  ;;  %v3100_v28 = vrot.slane %v1466_v60, 11  ;;  %v5250_v25 = vshll.u32 %v4712_v50, 16  ;;  %v5239_v60 = vshrl.u32 %v4758_v51, 16  ;;  %v1551_v29 = vshll.u32 %v4758_v51, 16 }
 0x298   : > { %3320 = vmatprep.subr.bf16.mxu1 %v3852_v32  ;;  %v3101_v17 = vrot.slane %v1479_v57, 11  ;;  %3640 = vmatpush3.bf16.msra.mxu0 %v4310_v5  ;;  %v1489_v42 = vor.u32 %v5251_v33, %v1486_v36  ;;  %v1543_v32 = vshrl.u32 %v3103_v53, 16  ;;  %v1504_v4 = vor.u32 %v4668_v44, %v4638_v47 }
 0x299   : > { %v1476_v8 = vor.u32 %v5250_v25, %v1473_v20  ;;  %2444 = vmatmul.mubr.bf16.gmra.mrb[20].mxu0 %v4748_v13  ;;  %v5252_v20 = vmov 0.0|0.0   ;;  %v1550_v25 = vrot.slane %v5239_v60, 7  ;;  %v5253_v53 = vshll.u32 %v4623_v43, 16 }
 0x29a   : > { %3641 = vmatprep.subr.bf16.mxu0 %v5252_v20  ;;  %2249 = vmatmul.mubr.bf16.gmra.mrb[8].mxu1 %v3107_v45  ;;  %v5254_v47 = vshrl.u32 %v4629_v30, 16  ;;  %v3855_v45 = vld [vmem:[%s5210_s2 + $0x98] sm:$0xff]   ;;  %v1505_v33 = vrot.slane %v1504_v4, 4  ;;  %v5255_v56 = vshll.u32 %v4629_v30, 16  ;;  %v5256_v4 = vor.u32 %v4589_v9, %v4587_v7 }
 0x29b   : > { %2451 = vmatprep.mubr.bf16.mxu0 %v4727_v49  ;;  %v4788_v57 = vsel %vm4579_vm8, %v3100_v28, %v1476_v8  ;;  %v1508_v36 = vrot.slane %v5253_v53, 5  ;;  %3321 = vmatpush3.bf16.msra.mxu1 %v3853_v1  ;;  %v4802_v28 = vsel %vm4579_vm8, %v3101_v17, %v1489_v42  ;;  %v3105_v8 = vrot.slane %v1543_v32, 11  ;;  %v3856_v1 = vld [vmem:[%s5210_s2 + $0xe0] sm:$0xff]  }
 0x29c   : > { %v1512_v44 = vrot.slane %v5254_v47, 4  ;;  %2256 = vmatprep.mubr.bf16.mxu1 %v4663_v23  ;;  %v1513_v43 = vrot.slane %v5255_v56, 5  ;;  %3322 = vmatprep.subr.bf16.mxu1 %v3854_v2  ;;  %v4811_v23 = vcombine.low %v4788_v57, %v4802_v28  ;;  %v1553_v53 = vor.u32 %v1551_v29, %v1550_v25 }
 0x29d   : > { %v1509_v47 = vor.u32 %v1508_v36, %v1507_v52  ;;  %v3120_v17 = vcombine.low %v4740_v6, %v4788_v57  ;;  %v4820_v56 = vrot.slane %v5256_v4, 4  ;;  %v5257_v2 = vshrl.u32 %v4649_v63, 16  ;;  %3643 = vmatpush3.bf16.msra.mxu0 %v4320_v27  ;;  %v3874_v6 = vld [vmem:[%s5210_s2 + $0x168] sm:$0xff]  }
 0x29e   : > { %v1514_v30 = vor.u32 %v1513_v43, %v1512_v44  ;;  %v5258_v32 = vshll.u32 %v4649_v63, 16  ;;  %v3131_v52 = vcombine.high %v4733_v37, %v4563_v39  ;;  %v4831_v25 = vsel %vm4579_vm8, %v3105_v8, %v1553_v53  ;;  %3644 = vmatprep.subr.bf16.mxu0 %v5252_v20  ;;  %v3857_v63 = vld [vmem:[%s5210_s2 + $0xa0] sm:$0xff]   ;;  %v3858_v53 = vld [vmem:[%s5210_s2 + $0xe8] sm:$0xff]  }
 0x29f   : > { %v1517_v42 = vrot.slane %v5257_v2, 4  ;;  %v1510_v36 = vrot.slane %v1509_v47, 4  ;;  %v5259_v7 = vshrl.u32 %v4659_v40, 16  ;;  %3323 = vmatpush3.bf16.msra.mxu1 %v3855_v45  ;;  %v4842_v44 = vsel %vm4046_vm2, %v1505_v33, %v4591_v10  ;;  %v3875_v57 = vld [vmem:[%s5210_s2 + $0x128] sm:$0xff]  }
 0x2a0   : > { %v1518_v60 = vrot.slane %v5258_v32, 5  ;;  %v1515_v39 = vrot.slane %v1514_v30, 4  ;;  %v5260_v8 = vshll.u32 %v4659_v40, 16  ;;  %3324 = vmatprep.subr.bf16.mxu1 %v3856_v1  ;;  %v3121_v47 = vcombine.low %v4802_v28, %v4831_v25  ;;  %v3878_v28 = vld [vmem:[%s5210_s2 + $0x178] sm:$0xff]  }
 0x2a1   : > { %v1522_v9 = vrot.slane %v5259_v7, 4  ;;  %v4852_v45 = vsel %vm4046_vm2, %v1510_v36, %v4591_v10  ;;  %v5261_v33 = vshrl.u32 %v4712_v50, 16  ;;  %2452 = vmatmul.mubr.bf16.gmra.mrb[24].mxu0 %v4811_v23  ;;  %v5264_v7 = vshll.u32 %v4716_v41, 16 }
 0x2a2   : > { %v1519_v61 = vor.u32 %v1518_v60, %v1517_v42  ;;  %v1523_v43 = vrot.slane %v5260_v8, 5  ;;  %v5262_v60 = vshll.u32 %v4712_v50, 16  ;;  %v4864_v1 = vsel %vm4046_vm2, %v1515_v39, %v4591_v10  ;;  %2257 = vmatmul.mubr.bf16.gmra.mrb[12].mxu1 %v4748_v13  ;;  %2459 = vmatprep.mubr.bf16.mxu0 %v3131_v52 }
 0x2a3   : > { %v1527_v4 = vrot.slane %v5261_v33, 4  ;;  %v5263_v42 = vshrl.u32 %v4716_v41, 16  ;;  %v4871_v36 = vcombine.low %v4852_v45, %v4864_v1  ;;  %v1533_v8 = vrot.slane %v5264_v7, 5  ;;  %3325 = vmatpush3.bf16.msra.mxu1 %v3857_v63  ;;  %2264 = vmatprep.mubr.bf16.mxu1 %v4727_v49  ;;  %v3860_v49 = vld [vmem:[%s5210_s2 + $0xf0] sm:$0xff]  }
 0x2a4   : > { %v1528_v40 = vrot.slane %v5262_v60, 5  ;;  %v1520_v30 = vrot.slane %v1519_v61, 4  ;;  %v1524_v2 = vor.u32 %v1523_v43, %v1522_v9  ;;  %v3126_v39 = vcombine.low %v4842_v44, %v4852_v45  ;;  %v3859_v9 = vld [vmem:[%s5210_s2 + $0xa8] sm:$0xff]   ;;  %3326 = vmatprep.subr.bf16.mxu1 %v3858_v53  ;;  %3646 = vmatpush3.bf16.msra.mxu0 %v4330_v11  ;;  %v3883_v45 = vld [vmem:[%s5210_s2 + $0x218] sm:$0xff]  }
 0x2a5   : > { %v1532_v32 = vrot.slane %v5263_v42, 4  ;;  %v3122_v41 = vcombine.high %v4603_v14, %v4606_v19  ;;  %v3123_v61 = vcombine.high %v4609_v24, %v4634_v46  ;;  %v5265_v53 = vshrl.u32 %v4758_v51, 16  ;;  %3647 = vmatprep.subr.bf16.mxu0 %v5252_v20  ;;  %v3884_v14 = vld [vmem:[%s5210_s2 + $0x220] sm:$0xff]   ;;  %v3885_v19 = vld [vmem:[%s5210_s2 + $0x228] sm:$0xff]   ;;  %v3886_v24 = vld [vmem:[%s5210_s2 + $0x230] sm:$0xff]  }
 0x2a6   : > { %v1529_v50 = vor.u32 %v1528_v40, %v1527_v4  ;;  %v4884_v13 = vsel %vm4046_vm2, %v1520_v30, %v4591_v10  ;;  %v1525_v52 = vrot.slane %v1524_v2, 4  ;;  %v3124_v4 = vcombine.high %v4645_v3, %v4702_v54  ;;  %v3887_v46 = vld [vmem:[%s5210_s2 + $0x238] sm:$0xff]  }
 0x2a7   : > { %v1534_v43 = vor.u32 %v1533_v8, %v1532_v32  ;;  %v3127_v33 = vcombine.low %v4864_v1, %v4884_v13  ;;  %v1555_v40 = vrot.slane %v5265_v53, 4  ;;  %v1556_v30 = vrot.slane %v1551_v29, 5  ;;  %3327 = vmatpush3.bf16.msra.mxu1 %v3859_v9  ;;  %v3861_v29 = vld [vmem:[%s5210_s2 + $0xb0] sm:$0xff]  }
 0x2a8   : > { %v1530_v63 = vrot.slane %v1529_v50, 4  ;;  %v4901_v60 = vsel %vm4046_vm2, %v1525_v52, %v4591_v10  ;;  %v3125_v2 = vcombine.high %v4705_v62, %v4733_v37  ;;  %v3130_v51 = vcombine.low %v4831_v25, %v4595_v15  ;;  %3328 = vmatprep.subr.bf16.mxu1 %v3860_v49  ;;  %v3862_v52 = vld [vmem:[%s5210_s2 + $0xf8] sm:$0xff]   ;;  %3649 = vmatpush3.bf16.msra.mxu0 %v4340_v16 }
 0x2a9   : > { %v4912_v42 = vcombine.low %v4884_v13, %v4901_v60  ;;  %v1535_v50 = vrot.slane %v1534_v43, 4  ;;  %v1557_v8 = vor.u32 %v1556_v30, %v1555_v40  ;;  %v4939_v15 = vsel %vm4046_vm2, %v4820_v56, %v4591_v10  ;;  %3650 = vmatprep.subr.bf16.mxu0 %v5252_v20  ;;  %v3863_v56 = vld [vmem:[%s5210_s2 + $0xb8] sm:$0xff]  }
 0x2aa   : > { %v4917_v32 = vsel %vm4046_vm2, %v1530_v63, %v4591_v10  ;;  %2460 = vmatmul.mubr.bf16.gmra.mrb[28].mxu0 %v3130_v51  ;;  %2265 = vmatmul.mubr.bf16.gmra.mrb[16].mxu1 %v4811_v23  ;;  %v5266_v43 = vmov 0.0   ;;  %v5267_v53 = vcombine.low %v4681_v0, %v4672_v58  ;;  %v3864_v23 = vld [vmem:[%s5210_s2 + $0x140] sm:$0xff]   ;;  %v3866_v0 = vld [vmem:[%s5210_s2 + $0x148] sm:$0xff]   ;;  %v3868_v51 = vld [vmem:[%s5210_s2 + $0x150] sm:$0xff]  }
 0x2ab   : > { %v3128_v7 = vcombine.low %v4901_v60, %v4917_v32  ;;  %v4932_v9 = vsel %vm4046_vm2, %v1535_v50, %v4591_v10  ;;  %v1558_v63 = vrot.slane %v1557_v8, 4  ;;  %3573 = vmatprep.mubr.msk.f32.mxu0 %vm3903_vm3, %v5266_v43  ;;  %3329 = vmatpush3.bf16.msra.mxu1 %v3861_v29  ;;  %v5268_v50 = vcombine.low %v4676_v59, %v4723_v18  ;;  %v3867_v29 = vld [vmem:[%s5210_s2 + $0x108] sm:$0xff]   ;;  %v3869_v8 = vld [vmem:[%s5210_s2 + $0x110] sm:$0xff]   ;;  %v3870_v59 = vld [vmem:[%s5210_s2 + $0x158] sm:$0xff]  }
 0x2ac   : > { %v4943_v49 = vcombine.low %v4917_v32, %v4932_v9  ;;  %2305 = vmatprep.mubr.bf16.mxu1 %v5267_v53  ;;  %3330 = vmatprep.subr.bf16.mxu1 %v3862_v52  ;;  %v3871_v18 = vld [vmem:[%s5210_s2 + $0x118] sm:$0xff]   ;;  %v3872_v52 = vld [vmem:[%s5210_s2 + $0x160] sm:$0xff]   ;;  %v3877_v53 = vld [vmem:[%s5210_s2 + $0x130] sm:$0xff]  }
 0x2ad   : > { %v4958_v40 = vsel %vm4046_vm2, %v1558_v63, %v4591_v10  ;;  %3652 = vmatpush3.bf16.msra.mxu0 %v4350_v21  ;;  %v3114_v10 = vcombine.low %v4939_v15, %v4842_v44  ;;  %v3873_v63 = vld [vmem:[%s5210_s2 + $0x120] sm:$0xff]   ;;  %v3879_v25 = vld [vmem:[%s5210_s2 + $0x138] sm:$0xff]   ;;  %v3882_v44 = vld [vmem:[%s5210_s2 + $0x210] sm:$0xff]  }
 0x2ae   : > { %v3129_v30 = vcombine.low %v4932_v9, %v4958_v40  ;;  %v3132_v58 = vcombine.low %v4958_v40, %v4939_v15  ;;  %3653 = vmatprep.subr.bf16.mxu0 %v5252_v20 }
 0x2af   : > { %3331 = vmatpush3.bf16.msra.mxu1 %v3863_v56  ;;  %v3881_v56 = vld [vmem:[%s5210_s2 + $0x208] sm:$0xff]  }
 0x2b0   : > { %3356 = vmatprep.subr.bf16.mxu1 %v3864_v23 }
 0x2b1   : > { %3655 = vmatpush3.bf16.msra.mxu0 %v4360_v22 }
 0x2b2   : > { %3656 = vmatprep.subr.bf16.mxu0 %v5252_v20  ;;  %2306 = vmatmul.mubr.bf16.vlgmr.msra.gmra.mrb[20].mxu1 %v3114_v10 }
 0x2b3   : > { %3357 = vmatpush3.bf16.msra.mxu1 %v3865_v35  ;;  %2313 = vmatprep.mubr.bf16.mxu1 %v5268_v50 }
 0x2b4   : > { %3358 = vmatprep.subr.bf16.mxu1 %v3866_v0 }
 0x2b5   : > { %3658 = vmatpush3.bf16.msra.mxu0 %v4370_v26 }
 0x2b7   : > { %3359 = vmatpush3.bf16.msra.mxu1 %v3867_v29 }
 0x2b8   : > { %3360 = vmatprep.subr.bf16.mxu1 %v3868_v51 }
 0x2ba   : > { %2314 = vmatmul.mubr.bf16.gmra.mrb[24].mxu1 %v4871_v36 }
 0x2bb   : > { %3361 = vmatpush3.bf16.msra.mxu1 %v3869_v8  ;;  %2321 = vmatprep.mubr.bf16.mxu1 %v3120_v17  ;;  %v3876_v17 = vld [vmem:[%s5210_s2 + $0x170] sm:$0xff]  }
 0x2bc   : > { %3362 = vmatprep.subr.bf16.mxu1 %v3870_v59 }
 0x2bf   : > { %3363 = vmatpush3.bf16.msra.mxu1 %v3871_v18 }
 0x2c0   : > { %3364 = vmatprep.subr.bf16.mxu1 %v3872_v52 }
 0x2c2   : > { %2322 = vmatmul.mubr.bf16.gmra.mrb[28].mxu1 %v4912_v42 }
 0x2c3   : > { %3365 = vmatpush3.bf16.msra.mxu1 %v3873_v63  ;;  %2329 = vmatprep.mubr.bf16.mxu1 %v3121_v47  ;;  %v3880_v47 = vld [vmem:[%s5210_s2 + $0x200] sm:$0xff]  }
 0x2c4   : > { %3366 = vmatprep.subr.bf16.mxu1 %v3874_v6 }
 0x2c7   : > { %3367 = vmatpush3.bf16.msra.mxu1 %v3875_v57 }
 0x2c8   : > { %3368 = vmatprep.subr.bf16.mxu1 %v3876_v17 }
 0x2ca   : > { %2330 = vmatmul.mubr.bf16.gmra.mrb[32].mxu1 %v4943_v49 }
 0x2cb   : > { %3369 = vmatpush3.bf16.msra.mxu1 %v3877_v53  ;;  %2370 = vmatprep.mubr.bf16.mxu1 %v3126_v39 }
 0x2cc   : > { %3370 = vmatprep.subr.bf16.mxu1 %v3878_v28 }
 0x2cf   : > { %3371 = vmatpush3.bf16.msra.mxu1 %v3879_v25 }
 0x2d0   : > { %3517 = vmatprep.subr.bf16.mxu1 %v3880_v47 }
 0x2d2   : > { %2371 = vmatmul.mubr.bf16.vlgmr.msra.gmra.mrb[36].mxu1 %v3122_v41 }
 0x2d3   : > { %3518 = vmatpush3.bf16.msra.mxu1 %v3880_v47  ;;  %2378 = vmatprep.mubr.bf16.mxu1 %v3127_v33 }
 0x2d4   : > { %3519 = vmatprep.subr.bf16.mxu1 %v3881_v56 }
 0x2d7   : > { %3520 = vmatpush3.bf16.msra.mxu1 %v3881_v56 }
 0x2d8   : > { %3521 = vmatprep.subr.bf16.mxu1 %v3882_v44 }
 0x2da   : > { %2379 = vmatmul.mubr.bf16.gmra.mrb[40].mxu1 %v3123_v61 }
 0x2db   : > { %3522 = vmatpush3.bf16.msra.mxu1 %v3882_v44  ;;  %2386 = vmatprep.mubr.bf16.mxu1 %v3128_v7 }
 0x2dc   : > { %3523 = vmatprep.subr.bf16.mxu1 %v3883_v45 }
 0x2df   : > { %3524 = vmatpush3.bf16.msra.mxu1 %v3883_v45 }
 0x2e0   : > { %3525 = vmatprep.subr.bf16.mxu1 %v3884_v14 }
 0x2e2   : > { %2387 = vmatmul.mubr.bf16.gmra.mrb[44].mxu1 %v3124_v4 }
 0x2e3   : > { %3526 = vmatpush3.bf16.msra.mxu1 %v3884_v14  ;;  %2394 = vmatprep.mubr.bf16.mxu1 %v3129_v30 }
 0x2e4   : > { %3527 = vmatprep.subr.bf16.mxu1 %v3885_v19 }
 0x2e7   : > { %3528 = vmatpush3.bf16.msra.mxu1 %v3885_v19 }
 0x2e8   : > { %3529 = vmatprep.subr.bf16.mxu1 %v3886_v24 }
 0x2ea   : > { %2395 = vmatmul.mubr.bf16.gmra.mrb[48].mxu1 %v3125_v2 }
 0x2eb   : > { %3530 = vmatpush3.bf16.msra.mxu1 %v3886_v24  ;;  %3533 = vmatprep.mubr.bf16.mxu1 %v4871_v36 }
 0x2ec   : > { %3531 = vmatprep.subr.bf16.mxu1 %v3887_v46 }
 0x2ef   : > { %3532 = vmatpush3.bf16.msra.mxu1 %v3887_v46 }
 0x2f0   : > { %3659 = vmatprep.subr.bf16.mxu1 %v5252_v20 }
 0x2f2   : > { %3534 = vmatmul.mubr.bf16.vlgmr.msra.gmra.mrb[52].mxu1 %v4912_v42 }
 0x2f3   : > { %3661 = vmatpush3.bf16.msra.mxu1 %v4299_v34  ;;  %3537 = vmatprep.mubr.bf16.mxu1 %v4943_v49 }
 0x2f4   : > { %3662 = vmatprep.subr.bf16.mxu1 %v5252_v20 }
 0x2f7   : > { %3664 = vmatpush3.bf16.msra.mxu1 %v4310_v5 }
 0x2f8   : > { %3665 = vmatprep.subr.bf16.mxu1 %v5252_v20 }
 0x2fa   : > { %3538 = vmatmul.mubr.bf16.gmra.mrb[56].mxu1 %v3132_v58 }
 0x2fb   : > { %3667 = vmatpush3.bf16.msra.mxu1 %v4320_v27  ;;  %3608 = vmatprep.mubr.msk.f32.mxu1 %vm3903_vm3, %v5266_v43 }
 0x2fc   : > { %3668 = vmatprep.subr.bf16.mxu1 %v5252_v20 }
 0x2ff   : > { %3670 = vmatpush3.bf16.msra.mxu1 %v4330_v11 }
 0x300   : > { %3671 = vmatprep.subr.bf16.mxu1 %v5252_v20 }
 0x303   : > { %3673 = vmatpush3.bf16.msra.mxu1 %v4340_v16 }
 0x304   : > { %3674 = vmatprep.subr.bf16.mxu1 %v5252_v20 }
 0x307   : > { %3676 = vmatpush3.bf16.msra.mxu1 %v4350_v21 }
 0x308   : > { %3677 = vmatprep.subr.bf16.mxu1 %v5252_v20 }
 0x30b   : > { %3679 = vmatpush3.bf16.msra.mxu1 %v4360_v22 }
 0x30c   : > { %3680 = vmatprep.subr.bf16.mxu1 %v5252_v20 }
 0x30f   : > { %3682 = vmatpush3.bf16.msra.mxu1 %v4370_v26 }
 0x312   : > { %3609 = vmatmul.mubr.f32.vlgmr.msra.gmra.mrb[2].mxu1 %v4457_v12 }
 0x364   : > { %v3412_v34 = vpop.f32.mrb[16].mxu0 }
 0x365   : > { %v3292_v5 = vpop.f32.mrb[4].mxu1  ;;  %v3413_v27 = vpop.f32.mrb[17].mxu0 }
 0x366   : > { %v3293_v11 = vpop.f32.mrb[5].mxu1  ;;  %v5104_v62 = vadd.f32 %v3413_v27, %v3412_v34  ;;  %v3415_v16 = vpop.f32.mrb[18].mxu0 }
 0x367   : > { %v3294_v54 = vadd.f32 %v3293_v11, %v3292_v5  ;;  %v3295_v3 = vpop.f32.mrb[6].mxu1  ;;  %v3416_v21 = vpop.f32.mrb[19].mxu0 }
 0x368   : > { %v3296_v37 = vpop.f32.mrb[7].mxu1  ;;  %v5106_v1 = vadd.f32 %v3416_v21, %v3415_v16 }
 0x369   : > { %v3297_v22 = vadd.f32 %v3296_v37, %v3295_v3 }
 0x36c   : > { %v3418_v36 = vpop.f32.mrb[20].mxu0 }
 0x36d   : > { %v3298_v20 = vpop.f32.mrb[8].mxu1  ;;  %v3419_v39 = vpop.f32.mrb[21].mxu0 }
 0x36e   : > { %v3299_v26 = vpop.f32.mrb[9].mxu1  ;;  %v5108_v13 = vadd.f32 %v3419_v39, %v3418_v36  ;;  %v3421_v12 = vpop.f32.mrb[22].mxu0 }
 0x36f   : > { %v3300_v41 = vadd.f32 %v3299_v26, %v3298_v20  ;;  %v3301_v61 = vpop.f32.mrb[10].mxu1  ;;  %v3422_v33 = vpop.f32.mrb[23].mxu0 }
 0x370   : > { %v3302_v4 = vpop.f32.mrb[11].mxu1  ;;  %v5110_v60 = vadd.f32 %v3422_v33, %v3421_v12 }
 0x371   : > { %v3303_v2 = vadd.f32 %v3302_v4, %v3301_v61 }
 0x374   : > { %v3424_v42 = vpop.f32.mrb[24].mxu0 }
 0x375   : > { %v3304_v32 = vpop.f32.mrb[12].mxu1  ;;  %v3425_v7 = vpop.f32.mrb[25].mxu0 }
 0x376   : > { %v3305_v9 = vpop.f32.mrb[13].mxu1  ;;  %v5112_v15 = vadd.f32 %v3425_v7, %v3424_v42  ;;  %v3427_v49 = vpop.f32.mrb[26].mxu0 }
 0x377   : > { %v3306_v43 = vadd.f32 %v3305_v9, %v3304_v32  ;;  %v3307_v40 = vpop.f32.mrb[14].mxu1  ;;  %v3428_v23 = vpop.f32.mrb[27].mxu0 }
 0x378   : > { %v3308_v30 = vpop.f32.mrb[15].mxu1  ;;  %v5114_v58 = vadd.f32 %v3428_v23, %v3427_v49 }
 0x379   : > { %v3309_v35 = vadd.f32 %v3308_v30, %v3307_v40 }
 0x37d   : > { %v3430_v10 = vpop.f32.mrb[28].mxu0  ;;  %v3310_v0 = vpop.f32.mrb[16].mxu1 }
 0x37e   : > { %v3431_v50 = vpop.f32.mrb[29].mxu0  ;;  %v3311_v29 = vpop.f32.mrb[17].mxu1 }
 0x37f   : > { %v5116_v51 = vadd.f32 %v3431_v50, %v3430_v10  ;;  %v3433_v8 = vpop.f32.mrb[30].mxu0  ;;  %v3312_v59 = vadd.f32 %v3311_v29, %v3310_v0  ;;  %v3313_v18 = vpop.f32.mrb[18].mxu1 }
 0x380   : > { %v3434_v52 = vpop.f32.mrb[31].mxu0  ;;  %v3314_v63 = vpop.f32.mrb[19].mxu1 }
 0x381   : > { %v5118_v6 = vadd.f32 %v3434_v52, %v3433_v8  ;;  %v3315_v57 = vadd.f32 %v3314_v63, %v3313_v18 }
 0x385   : > { %v3332_v17 = vpop.f32.mrb[20].mxu1 }
 0x386   : > { %v3333_v53 = vpop.f32.mrb[21].mxu1 }
 0x387   : > { %v3334_v28 = vadd.f32 %v3333_v53, %v3332_v17  ;;  %v3335_v25 = vpop.f32.mrb[22].mxu1 }
 0x388   : > { %v3336_v47 = vpop.f32.mrb[23].mxu1 }
 0x389   : > { %v2308_v56 = vadd.f32 %v3334_v28, %v3294_v54  ;;  %v3337_v44 = vadd.f32 %v3336_v47, %v3335_v25 }
 0x38b   : > { %v2311_v45 = vadd.f32 %v3337_v44, %v3297_v22 }
 0x38d   : > { %v3338_v14 = vpop.f32.mrb[24].mxu1 }
 0x38e   : > { %v3339_v19 = vpop.f32.mrb[25].mxu1 }
 0x38f   : > { %v3340_v24 = vadd.f32 %v3339_v19, %v3338_v14  ;;  %v3341_v46 = vpop.f32.mrb[26].mxu1 }
 0x390   : > { %v3342_v34 = vpop.f32.mrb[27].mxu1 }
 0x391   : > { %v2316_v5 = vadd.f32 %v3340_v24, %v3300_v41  ;;  %v3343_v27 = vadd.f32 %v3342_v34, %v3341_v46 }
 0x393   : > { %v2319_v11 = vadd.f32 %v3343_v27, %v3303_v2 }
 0x395   : > { %v3344_v16 = vpop.f32.mrb[28].mxu1 }
 0x396   : > { %v3345_v3 = vpop.f32.mrb[29].mxu1 }
 0x397   : > { %v3346_v21 = vadd.f32 %v3345_v3, %v3344_v16  ;;  %v3347_v37 = vpop.f32.mrb[30].mxu1 }
 0x398   : > { %v3348_v36 = vpop.f32.mrb[31].mxu1 }
 0x399   : > { %v2324_v20 = vadd.f32 %v3346_v21, %v3306_v43  ;;  %v3349_v39 = vadd.f32 %v3348_v36, %v3347_v37 }
 0x39b   : > { %v2327_v26 = vadd.f32 %v3349_v39, %v3309_v35 }
 0x39d   : > { %v3350_v12 = vpop.f32.mrb[32].mxu1 }
 0x39e   : > { %v3351_v54 = vpop.f32.mrb[33].mxu1 }
 0x39f   : > { %v3352_v61 = vadd.f32 %v3351_v54, %v3350_v12  ;;  %v3353_v22 = vpop.f32.mrb[34].mxu1 }
 0x3a0   : > { %v3354_v33 = vpop.f32.mrb[35].mxu1 }
 0x3a1   : > { %v2332_v4 = vadd.f32 %v3352_v61, %v3312_v59  ;;  %v3355_v42 = vadd.f32 %v3354_v33, %v3353_v22 }
 0x3a3   : > { %v2335_v32 = vadd.f32 %v3355_v42, %v3315_v57 }
 0x3a5   : > { %v3372_v7 = vpop.f32.mrb[36].mxu1 }
 0x3a6   : > { %v3373_v41 = vpop.f32.mrb[37].mxu1 }
 0x3a7   : > { %v3374_v9 = vadd.f32 %v3373_v41, %v3372_v7  ;;  %v3375_v2 = vpop.f32.mrb[38].mxu1 }
 0x3a8   : > { %v3376_v49 = vpop.f32.mrb[39].mxu1 }
 0x3a9   : > { %v2373_v40 = vadd.f32 %v3374_v9, %v2308_v56  ;;  %v3377_v23 = vadd.f32 %v3376_v49, %v3375_v2 }
 0x3ab   : > { %v2376_v30 = vadd.f32 %v3377_v23, %v2311_v45  ;;  %v2438_v43 = vadd.f32 %v5104_v62, %v2373_v40 }
 0x3ad   : > { %v3378_v10 = vpop.f32.mrb[40].mxu1  ;;  %v2441_v35 = vadd.f32 %v5106_v1, %v2376_v30 }
 0x3ae   : > { %v3379_v0 = vpop.f32.mrb[41].mxu1 }
 0x3af   : > { %v3380_v50 = vadd.f32 %v3379_v0, %v3378_v10  ;;  %v3381_v29 = vpop.f32.mrb[42].mxu1 }
 0x3b0   : > { %v3382_v8 = vpop.f32.mrb[43].mxu1 }
 0x3b1   : > { %v2381_v59 = vadd.f32 %v3380_v50, %v2316_v5  ;;  %v3383_v18 = vadd.f32 %v3382_v8, %v3381_v29 }
 0x3b3   : > { %v2384_v52 = vadd.f32 %v3383_v18, %v2319_v11  ;;  %v2446_v63 = vadd.f32 %v5108_v13, %v2381_v59 }
 0x3b5   : > { %v3384_v57 = vpop.f32.mrb[44].mxu1  ;;  %v2449_v17 = vadd.f32 %v5110_v60, %v2384_v52 }
 0x3b6   : > { %v3385_v53 = vpop.f32.mrb[45].mxu1 }
 0x3b7   : > { %v3386_v28 = vadd.f32 %v3385_v53, %v3384_v57  ;;  %v3387_v25 = vpop.f32.mrb[46].mxu1 }
 0x3b8   : > { %v3388_v47 = vpop.f32.mrb[47].mxu1 }
 0x3b9   : > { %v2389_v62 = vadd.f32 %v3386_v28, %v2324_v20  ;;  %v3389_v56 = vadd.f32 %v3388_v47, %v3387_v25 }
 0x3bb   : > { %v2392_v44 = vadd.f32 %v3389_v56, %v2327_v26  ;;  %v2454_v1 = vadd.f32 %v5112_v15, %v2389_v62 }
 0x3bd   : > { %v3390_v45 = vpop.f32.mrb[48].mxu1  ;;  %v2457_v14 = vadd.f32 %v5114_v58, %v2392_v44 }
 0x3be   : > { %v3391_v19 = vpop.f32.mrb[49].mxu1 }
 0x3bf   : > { %v3392_v24 = vadd.f32 %v3391_v19, %v3390_v45  ;;  %v3393_v46 = vpop.f32.mrb[50].mxu1 }
 0x3c0   : > { %v3394_v34 = vpop.f32.mrb[51].mxu1 }
 0x3c1   : > { %v2397_v13 = vadd.f32 %v3392_v24, %v2332_v4  ;;  %v3395_v5 = vadd.f32 %v3394_v34, %v3393_v46 }
 0x3c3   : > { %v2400_v27 = vadd.f32 %v3395_v5, %v2335_v32  ;;  %v2462_v60 = vadd.f32 %v5116_v51, %v2397_v13 }
 0x3c5   : > { %v3535_v11 = vpop.f32.mrb[52].mxu1  ;;  %v2465_v16 = vadd.f32 %v5118_v6, %v2400_v27 }
 0x3c6   : > { %v5128_v3 = vadd.f32 %v3535_v11, %v2446_v63  ;;  %v2502_v21 = vpop.f32.mrb[53].mxu1 }
 0x3c7   : > { %v5130_v37 = vadd.f32 %v2502_v21, %v2438_v43  ;;  %v3536_v15 = vpop.f32.mrb[54].mxu1 }
 0x3c8   : > { %v5132_v36 = vadd.f32 %v3536_v15, %v2449_v17  ;;  %v2505_v58 = vpop.f32.mrb[55].mxu1  ;;  %v2548_v26 = vmul.f32 %v5128_v3, %v5128_v3  ;;  %v5270_v15 = vld [vmem:[#allocation3_spill] sm:$0xff] }
 0x3c9   : > { %v5134_v20 = vadd.f32 %v2505_v58, %v2441_v35  ;;  %v2546_v39 = vmul.f32 %v5130_v37, %v5130_v37 }
 0x3ca   : > { %v2549_v4 = vmul.f32 %v5132_v36, %v5132_v36 }
 0x3cb   : > { %v2533_v51 = vadd.f32 %v5134_v20, %v5130_v37  ;;  %v2547_v6 = vmul.f32 %v5134_v20, %v5134_v20 }
 0x3cd   : > { %v2534_v12 = vadd.f32 %v2533_v51, %v5128_v3  ;;  %v2554_v54 = vadd.f32 %v2547_v6, %v2546_v39  ;;  %v3539_v61 = vpop.f32.mrb[56].mxu1  ;;  %v5271_v39 = vld [vmem:[#allocation4_spill] sm:$0xff]  ;;  %v5272_v6 = vld [vmem:[#allocation5_spill] sm:$0xff] }
 0x3ce   : > { %v5145_v22 = vadd.f32 %v3539_v61, %v2462_v60  ;;  %v2518_v33 = vpop.f32.mrb[57].mxu1 }
 0x3cf   : > { %v2555_v42 = vadd.f32 %v2554_v54, %v2548_v26  ;;  %v5149_v32 = vadd.f32 %v2518_v33, %v2454_v1  ;;  %v2535_v7 = vadd.f32 %v2534_v12, %v5132_v36  ;;  %v3540_v41 = vpop.f32.mrb[58].mxu1  ;;  %v5273_v54 = vld [vmem:[#allocation6_spill] sm:$0xff] }
 0x3d0   : > { %v5152_v9 = vadd.f32 %v3540_v41, %v2465_v16  ;;  %v2521_v2 = vpop.f32.mrb[59].mxu1  ;;  %v2552_v0 = vmul.f32 %v5145_v22, %v5145_v22  ;;  %v5269_v16 = vld [vmem:[#allocation2_spill] sm:$0xff] }
 0x3d1   : > { %v2536_v49 = vadd.f32 %v2535_v7, %v5149_v32  ;;  %v2550_v40 = vmul.f32 %v5149_v32, %v5149_v32  ;;  %v2556_v23 = vadd.f32 %v2555_v42, %v2549_v4  ;;  %v5157_v30 = vadd.f32 %v2521_v2, %v2457_v14 }
 0x3d2   : > { %v2553_v8 = vmul.f32 %v5152_v9, %v5152_v9 }
 0x3d3   : > { %v2557_v43 = vadd.f32 %v2556_v23, %v2550_v40  ;;  %v2537_v10 = vadd.f32 %v2536_v49, %v5157_v30  ;;  %v2551_v35 = vmul.f32 %v5157_v30, %v5157_v30 }
 0x3d5   : > { %v2538_v50 = vadd.f32 %v2537_v10, %v5145_v22  ;;  %v2558_v29 = vadd.f32 %v2557_v43, %v2551_v35 }
 0x3d7   : > { %v2539_v59 = vadd.f32 %v2538_v50, %v5152_v9  ;;  %v2559_v18 = vadd.f32 %v2558_v29, %v2552_v0 }
 0x3d9   : > { %v2540_v52 = vrot.slane %v2539_v59, 4  ;;  %v2560_v63 = vadd.f32 %v2559_v18, %v2553_v8 }
 0x3db   : > { %v2541_v57 = vadd.f32 %v2540_v52, %v2539_v59  ;;  %v2561_v17 = vrot.slane %v2560_v63, 4  ;;  %v3207_v52 = vld [vmem:[%s5216_s8] ss:$0 sm:$0xff] }
 0x3dd   : > { %v2542_v53 = vrot.slane %v2541_v57, 2  ;;  %v2562_v28 = vadd.f32 %v2561_v17, %v2560_v63 }
 0x3df   : > { %v2543_v25 = vadd.f32 %v2542_v53, %v2541_v57  ;;  %v2563_v47 = vrot.slane %v2562_v28, 2 }
 0x3e1   : > { %v2544_v62 = vrot.slane %v2543_v25, 1  ;;  %v2564_v56 = vadd.f32 %v2563_v47, %v2562_v28 }
 0x3e3   : > { %v2565_v44 = vrot.slane %v2564_v56, 1  ;;  %v2545_v45 = vadd.f32 %v2544_v62, %v2543_v25  ;;  %v3208_v25 = vld [vmem:[%s5217_s9] ss:$0 sm:$0xff] }
 0x3e5   : > { %v2802_v1 = vpop.f32.mrb[2].mxu1  ;;  %v2566_v14 = vadd.f32 %v2565_v44, %v2564_v56 }
 0x3e6   : > { %v2806_v19 = vmul.f32 0.0078125, %v2802_v1  ;;  %v3610_v24 = vpop.f32.mrb[3].mxu1 }
 0x3e7   : > { %v2567_v46 = vsel %vm1147_vm4, %v2545_v45, %v2566_v14 }
 0x3e8   : > { %v2807_v34 = vmul.f32 %v2806_v19, %v2806_v19  ;;  %v2818_v13 = vrot.slane %v2806_v19, %v4559_v55  ;;  %3574 = vmatmul.mubr.f32.vlgmr.msra.gmra.mrb[32].mxu0 %v2567_v46 }
 0x3ea   : > { %v2809_v5 = vrot.slane %v2807_v34, 7  ;;  %v2819_v27 = vsub.f32 %v4377_v31, %v2818_v13  ;;  %v2820_v60 = vsub.f32 %v4387_v38, %v2818_v13  ;;  %v2821_v11 = vsub.f32 %v4400_v48, %v2818_v13  ;;  %v5274_v31 = vld [vmem:[#allocation7_spill] sm:$0xff] }
 0x3eb   : > { %v2822_v21 = vsub.f32 %v5269_v16, %v2818_v13  ;;  %v2823_v58 = vsub.f32 %v5270_v15, %v2818_v13  ;;  %v2824_v51 = vsub.f32 %v5271_v39, %v2818_v13  ;;  %v2825_v26 = vsub.f32 %v5272_v6, %v2818_v13 }
 0x3ec   : > { %v2811_v12 = vsub.f32 %v2806_v19, %v2809_v5  ;;  %v2826_v61 = vsub.f32 %v5273_v54, %v2818_v13 }
 0x3ee   : > { %v2812_v33 = vmax.f32 %v2811_v12, 0.0 }
 0x3f0   : > { %v2813_v4 = vadd.f32 1e-05, %v2812_v33 }
 0x3f2   : > { %3890 = vrsqrt.f32 %v2813_v4 }
 0x3fc   : > { %v3891_v42 = vpop.eup %3890 }
 0x3fd   : > { %v2830_v7 = vrot.slane %v3891_v42, %v5274_v31 }
 0x3ff   : > { %v2831_v38 = vmul.f32 %v2830_v7, %v2819_v27  ;;  %v2832_v41 = vmul.f32 %v2830_v7, %v2820_v60  ;;  %v2833_v48 = vmul.f32 %v2830_v7, %v2821_v11  ;;  %v2834_v2 = vmul.f32 %v2830_v7, %v2822_v21 }
 0x400   : > { %v2835_v49 = vmul.f32 %v2830_v7, %v2823_v58  ;;  %v2836_v40 = vmul.f32 %v2830_v7, %v2824_v51  ;;  %v2837_v23 = vmul.f32 %v2830_v7, %v2825_v26  ;;  %v2838_v43 = vmul.f32 %v2830_v7, %v2826_v61 }
 0x401   : > { %v2846_v63 = vmul.f32 %v3207_v52, %v2831_v38  ;;  %v2847_v57 = vmul.f32 %v3207_v52, %v2832_v41  ;;  %v2848_v17 = vmul.f32 %v3207_v52, %v2833_v48  ;;  %v2849_v53 = vmul.f32 %v3207_v52, %v2834_v2 }
 0x402   : > { %v2850_v28 = vmul.f32 %v3207_v52, %v2835_v49  ;;  %v2851_v47 = vmul.f32 %v3207_v52, %v2836_v40  ;;  %v2852_v62 = vmul.f32 %v3207_v52, %v2837_v23  ;;  %v2853_v56 = vmul.f32 %v3207_v52, %v2838_v43 }
 0x403   : > { %v2861_v1 = vadd.f32 %v3208_v25, %v2846_v63  ;;  %v2862_v45 = vadd.f32 %v3208_v25, %v2847_v57  ;;  %v2863_v14 = vadd.f32 %v3208_v25, %v2848_v17  ;;  %v2864_v19 = vadd.f32 %v3208_v25, %v2849_v53 }
 0x404   : > { %v2865_v24 = vadd.f32 %v3208_v25, %v2850_v28  ;;  %v2866_v34 = vadd.f32 %v3208_v25, %v2851_v47  ;;  %v2867_v13 = vadd.f32 %v3208_v25, %v2852_v62  ;;  %v2868_v5 = vadd.f32 %v3208_v25, %v2853_v56 }
 0x4bb   : > { %v2634_v10 = vpop.f32.mrb[32].mxu0 }
 0x4bc   : > { %v2638_v35 = vmul.f32 0.0078125, %v2634_v10  ;;  %v3575_v0 = vpop.f32.mrb[33].mxu0 }
 0x4be   : > { %v2639_v50 = vmul.f32 %v2638_v35, %v2638_v35  ;;  %v2650_v44 = vrot.slane %v2638_v35, %v4559_v55 }
 0x4c0   : > { %v2641_v29 = vrot.slane %v2639_v50, 7  ;;  %v2651_v27 = vsub.f32 %v5130_v37, %v2650_v44  ;;  %v2652_v60 = vsub.f32 %v5134_v20, %v2650_v44  ;;  %v2653_v11 = vsub.f32 %v5128_v3, %v2650_v44  ;;  %v3205_v37 = vld [vmem:[%s5214_s6] ss:$0 sm:$0xff] }
 0x4c1   : > { %v2654_v16 = vsub.f32 %v5132_v36, %v2650_v44  ;;  %v2655_v55 = vsub.f32 %v5149_v32, %v2650_v44  ;;  %v2656_v15 = vsub.f32 %v5157_v30, %v2650_v44  ;;  %v2657_v58 = vsub.f32 %v5145_v22, %v2650_v44  ;;  %v3206_v32 = vld [vmem:[%s5215_s7] ss:$0 sm:$0xff] }
 0x4c2   : > { %v2643_v8 = vsub.f32 %v2638_v35, %v2641_v29  ;;  %v2658_v39 = vsub.f32 %v5152_v9, %v2650_v44 }
 0x4c4   : > { %v2644_v59 = vmax.f32 %v2643_v8, 0.0 }
 0x4c6   : > { %v2645_v18 = vadd.f32 1e-05, %v2644_v59 }
 0x4c8   : > { %3892 = vrsqrt.f32 %v2645_v18 }
 0x4d2   : > { %v3893_v46 = vpop.eup %3892 }
 0x4d3   : > { %v2662_v21 = vrot.slane %v3893_v46, %v5274_v31 }
 0x4d5   : > { %v2663_v51 = vmul.f32 %v2662_v21, %v2651_v27  ;;  %v2664_v20 = vmul.f32 %v2662_v21, %v2652_v60  ;;  %v2665_v6 = vmul.f32 %v2662_v21, %v2653_v11  ;;  %v2666_v3 = vmul.f32 %v2662_v21, %v2654_v16 }
 0x4d6   : > { %v2667_v26 = vmul.f32 %v2662_v21, %v2655_v55  ;;  %v2668_v36 = vmul.f32 %v2662_v21, %v2656_v15  ;;  %v2669_v12 = vmul.f32 %v2662_v21, %v2657_v58  ;;  %v2670_v54 = vmul.f32 %v2662_v21, %v2658_v39 }
 0x4d7   : > { %v2678_v30 = vmul.f32 %v3205_v37, %v2663_v51  ;;  %v2679_v22 = vmul.f32 %v3205_v37, %v2664_v20  ;;  %v2680_v9 = vmul.f32 %v3205_v37, %v2665_v6  ;;  %v2681_v61 = vmul.f32 %v3205_v37, %v2666_v3 }
 0x4d8   : > { %v2682_v33 = vmul.f32 %v3205_v37, %v2667_v26  ;;  %v2683_v4 = vmul.f32 %v3205_v37, %v2668_v36  ;;  %v2684_v42 = vmul.f32 %v3205_v37, %v2669_v12  ;;  %v2685_v31 = vmul.f32 %v3205_v37, %v2670_v54 }
 0x4d9   : > { %v2693_v7 = vadd.f32 %v3206_v32, %v2678_v30  ;;  %v2694_v38 = vadd.f32 %v3206_v32, %v2679_v22  ;;  %v2695_v41 = vadd.f32 %v3206_v32, %v2680_v9  ;;  %v2696_v48 = vadd.f32 %v3206_v32, %v2681_v61 }
 0x4da   : > { %v2697_v2 = vadd.f32 %v3206_v32, %v2682_v33  ;;  %v2698_v49 = vadd.f32 %v3206_v32, %v2683_v4  ;;  %v2699_v40 = vadd.f32 %v3206_v32, %v2684_v42  ;;  %v2700_v23 = vadd.f32 %v3206_v32, %v2685_v31 }
 0x4db   : > { %v2869_v43 = vadd.f32 %v2861_v1, %v2693_v7  ;;  %v2870_v10 = vadd.f32 %v2862_v45, %v2694_v38  ;;  %v2871_v35 = vadd.f32 %v2863_v14, %v2695_v41  ;;  %v2872_v0 = vadd.f32 %v2864_v19, %v2696_v48 }
 0x4dc   : > { %v2873_v50 = vadd.f32 %v2865_v24, %v2697_v2  ;;  %v2874_v29 = vadd.f32 %v2866_v34, %v2698_v49  ;;  %v2875_v8 = vadd.f32 %v2867_v13, %v2699_v40  ;;  %v2876_v59 = vadd.f32 %v2868_v5, %v2700_v23 }
 0x4dd   : > { %v2877_v18 = vmax.f32 %v2869_v43, 0.0  ;;  %v2878_v52 = vmax.f32 %v2870_v10, 0.0  ;;  %v2879_v63 = vmax.f32 %v2871_v35, 0.0  ;;  %v2880_v57 = vmax.f32 %v2872_v0, 0.0 }
 0x4de   : > { %v2881_v17 = vmax.f32 %v2873_v50, 0.0  ;;  %v2882_v53 = vmax.f32 %v2874_v29, 0.0  ;;  %v2883_v28 = vmax.f32 %v2875_v8, 0.0  ;;  %v2884_v25 = vmax.f32 %v2876_v59, 0.0 }
 0x4df   : > { %v3239_v47 = vpack.c.bf16 %v2878_v52, %v2877_v18  ;;  %v3244_v62 = vpack.c.bf16 %v2880_v57, %v2879_v63 }
 0x4e0   : > { %v3249_v56 = vpack.c.bf16 %v2882_v53, %v2881_v17  ;;  %v3254_v44 = vpack.c.bf16 %v2884_v25, %v2883_v28 }
 0x4e1   : > { %3240 = vst [vmem:[%s359_s15] sm:$0xff] %v3239_v47   ;;  %3256 = vst [vmem:[%s359_s15 + $0x8] sm:$0xff] %v3244_v62  }
 0x4e2   : > { %3257 = vst [vmem:[%s359_s15 + $0x10] sm:$0xff] %v3249_v56   ;;  %3258 = vst [vmem:[%s359_s15 + $0x18] sm:$0xff] %v3254_v44  }
 0x4e3 PF: > { %s20_s13 = sadd.s32 1, %s3900_s13  }
 0x4e4   : > { %p17_p4 = scmp.ge.s32.totalorder %s20_s13, 4  }
 0x4e6   :  { %19 = sbr.rel (!%p17_p4) target bundleno = 1 (0x1), region = 90 }

</bundles_post_ra>
